<compile_context>
chip_gen: v7x
topology: tpu7x:2x2x1
jax: 0.10.0
libtpu: 0.0.40
codegen_flags: <defaults>
</compile_context>

<pallas_src>
import functools

import jax
import jax.numpy as jnp
from jax.experimental import pallas as pl
from jax.experimental.pallas import tpu as pltpu


# ----------------------------------------------------------------------------
# helpers: padding + tile selection
# ----------------------------------------------------------------------------
def _round_up(x, m):
    return ((x + m - 1) // m) * m


def _pick_tile(dim, pref, align):
    """Return (padded_dim, tile) with tile % align == 0 (or == padded_dim) and
    tile | padded_dim.  Pads only up to the alignment granule."""
    p = _round_up(dim, align)
    if p <= pref:
        return p, p
    best = align
    for t in range(align, pref + 1, align):
        if p % t == 0:
            best = t
    return p, best


def _pad2(a, rows, cols):
    r, c = a.shape
    if (r, c) == (rows, cols):
        return a
    return jnp.pad(a, ((0, rows - r), (0, cols - c)))


# ----------------------------------------------------------------------------
# Pallas kernels
# ----------------------------------------------------------------------------
def _linear_kernel(*refs, activation, nk, has_residual):
    """Tiled GEMM with f32 accumulator.  Bias / activation / residual are applied
    only on the final K step."""
    if has_residual:
        x_ref, w_ref, b_ref, r_ref, o_ref, acc_ref = refs
    else:
        x_ref, w_ref, b_ref, o_ref, acc_ref = refs
        r_ref = None
    k = pl.program_id(2)

    @pl.when(k == 0)
    def _():
        acc_ref[...] = jnp.zeros_like(acc_ref)

    acc_ref[...] += jnp.dot(x_ref[...], w_ref[...],
                            preferred_element_type=jnp.float32)

    @pl.when(k == nk - 1)
    def _():
        acc = acc_ref[...] + b_ref[...].astype(jnp.float32)
        if activation == "gelu":
            acc = jax.nn.gelu(acc)          # tanh approx (see TODO at top)
        if r_ref is not None:
            acc = acc + r_ref[...].astype(jnp.float32)
        o_ref[...] = acc.astype(o_ref.dtype)


def linear(x, w, b, activation=None, residual=None, out_dtype=jnp.bfloat16,
           tm=256, tn=256, tk=512):
    """x:(M,K) @ w:(K,N) + b, optional fused residual add.  bf16 operands,
    f32 accumulation, tiled over (M, N, K).  Tile prefs target the 256x256 MXU
    on v6e/v7x while keeping the double-buffered footprint well under the
    64 MiB VMEM of v7x; on v5e the 128-multiples still match the 128x128 MXU."""
    M, K = x.shape
    _, N = w.shape
    Mp, tm_ = _pick_tile(M, tm, 8)
    Kp, tk_ = _pick_tile(K, tk, 128)
    Np, tn_ = _pick_tile(N, tn, 128)

    xp = _pad2(x.astype(jnp.bfloat16), Mp, Kp)
    wp = _pad2(w.astype(jnp.bfloat16), Kp, Np)
    bp = _pad2(b.reshape(1, N).astype(jnp.float32), 1, Np)

    grid = (Mp // tm_, Np // tn_, Kp // tk_)
    in_specs = [
        pl.BlockSpec((tm_, tk_), lambda i, j, k: (i, k)),
        pl.BlockSpec((tk_, tn_), lambda i, j, k: (k, j)),
        pl.BlockSpec((1, tn_), lambda i, j, k: (0, j)),
    ]
    args = [xp, wp, bp]
    if residual is not None:
        rp = _pad2(residual.astype(jnp.bfloat16), Mp, Np)
        in_specs.append(pl.BlockSpec((tm_, tn_), lambda i, j, k: (i, j)))
        args.append(rp)

    out = pl.pallas_call(
        functools.partial(_linear_kernel, activation=activation, nk=grid[2],
                          has_residual=residual is not None),
        out_shape=jax.ShapeDtypeStruct((Mp, Np), out_dtype),
        grid=grid,
        in_specs=in_specs,
        out_specs=pl.BlockSpec((tm_, tn_), lambda i, j, k: (i, j)),
        scratch_shapes=[pltpu.VMEM((tm_, tn_), jnp.float32)],
        compiler_params=pltpu.CompilerParams(
            dimension_semantics=("parallel", "parallel", "arbitrary")),
    )(*args)
    return out[:M, :N]


def _ln_linear_kernel(x_ref, g_ref, bl_ref, w_ref, b_ref, o_ref, *, eps):
    """Fused LayerNorm (over full feature dim) + matmul + bias."""
    x = x_ref[...].astype(jnp.float32)
    mu = jnp.mean(x, axis=-1, keepdims=True)
    var = jnp.mean((x - mu) ** 2, axis=-1, keepdims=True)
    xn = (x - mu) * jax.lax.rsqrt(var + eps)
    xn = xn * g_ref[...].astype(jnp.float32) + bl_ref[...].astype(jnp.float32)
    acc = jnp.dot(xn.astype(w_ref.dtype), w_ref[...],
                  preferred_element_type=jnp.float32)
    acc = acc + b_ref[...].astype(jnp.float32)
    o_ref[...] = acc.astype(o_ref.dtype)


def ln_linear(x, gamma, beta, w, b, out_dtype=jnp.bfloat16, eps=1e-6,
              tm=256, tn=256):
    """LayerNorm(x) @ w + b, normalization fused into the matmul kernel so the
    normalized activation never round-trips through HBM.  Full K (=D) block."""
    M, D = x.shape
    _, N = w.shape
    Mp, tm_ = _pick_tile(M, tm, 8)
    Np, tn_ = _pick_tile(N, tn, 128)

    xp = _pad2(x.astype(jnp.bfloat16), Mp, D)
    g2 = gamma.reshape(1, D).astype(jnp.float32)
    bl2 = beta.reshape(1, D).astype(jnp.float32)
    wp = _pad2(w.astype(jnp.bfloat16), D, Np)
    bp = _pad2(b.reshape(1, N).astype(jnp.float32), 1, Np)

    grid = (Mp // tm_, Np // tn_)
    out = pl.pallas_call(
        functools.partial(_ln_linear_kernel, eps=eps),
        out_shape=jax.ShapeDtypeStruct((Mp, Np), out_dtype),
        grid=grid,
        in_specs=[
            pl.BlockSpec((tm_, D), lambda i, j: (i, 0)),
            pl.BlockSpec((1, D), lambda i, j: (0, 0)),
            pl.BlockSpec((1, D), lambda i, j: (0, 0)),
            pl.BlockSpec((D, tn_), lambda i, j: (0, j)),
            pl.BlockSpec((1, tn_), lambda i, j: (0, j)),
        ],
        out_specs=pl.BlockSpec((tm_, tn_), lambda i, j: (i, j)),
        compiler_params=pltpu.CompilerParams(
            dimension_semantics=("parallel", "parallel")),
    )(xp, g2, bl2, wp, bp)
    return out[:M, :N]


def _ln_mlp_kernel(x_ref, g_ref, bl_ref, w1_ref, b1_ref, w2_ref, b2_ref,
                   o_ref, xn_ref, acc_ref, *, eps, nh):
    """Fused LN + fc1 + GELU + fc2 + residual.  Hidden axis is the reduction grid
    axis; the normalized input is cached in VMEM scratch at h==0, the (tm, D)
    output accumulator lives in VMEM across hidden tiles."""
    h = pl.program_id(1)

    @pl.when(h == 0)
    def _():
        x = x_ref[...].astype(jnp.float32)
        mu = jnp.mean(x, axis=-1, keepdims=True)
        var = jnp.mean((x - mu) ** 2, axis=-1, keepdims=True)
        xn = (x - mu) * jax.lax.rsqrt(var + eps)
        xn = xn * g_ref[...].astype(jnp.float32) + bl_ref[...].astype(jnp.float32)
        xn_ref[...] = xn.astype(xn_ref.dtype)
        acc_ref[...] = jnp.zeros_like(acc_ref)

    hid = jnp.dot(xn_ref[...], w1_ref[...], preferred_element_type=jnp.float32)
    hid = jax.nn.gelu(hid + b1_ref[...].astype(jnp.float32))
    acc_ref[...] += jnp.dot(hid.astype(w2_ref.dtype), w2_ref[...],
                            preferred_element_type=jnp.float32)

    @pl.when(h == nh - 1)
    def _():
        out = (acc_ref[...] + b2_ref[...].astype(jnp.float32)
               + x_ref[...].astype(jnp.float32))          # residual
        o_ref[...] = out.astype(o_ref.dtype)


def ln_mlp(x, gamma, beta, w1, b1, w2, b2, eps=1e-6, out_dtype=jnp.bfloat16,
           tm=256, th=512):
    M, D = x.shape
    _, Hd = w1.shape
    Mp, tm_ = _pick_tile(M, tm, 8)
    Hp, th_ = _pick_tile(Hd, th, 128)

    xp = _pad2(x.astype(jnp.bfloat16), Mp, D)
    g2 = gamma.reshape(1, D).astype(jnp.float32)
    bl2 = beta.reshape(1, D).astype(jnp.float32)
    w1p = _pad2(w1.astype(jnp.bfloat16), D, Hp)
    b1p = _pad2(b1.reshape(1, Hd).astype(jnp.float32), 1, Hp)
    w2p = _pad2(w2.astype(jnp.bfloat16), Hp, D)
    b2p = b2.reshape(1, D).astype(jnp.float32)

    grid = (Mp // tm_, Hp // th_)
    out = pl.pallas_call(
        functools.partial(_ln_mlp_kernel, eps=eps, nh=grid[1]),
        out_shape=jax.ShapeDtypeStruct((Mp, D), out_dtype),
        grid=grid,
        in_specs=[
            pl.BlockSpec((tm_, D), lambda i, h: (i, 0)),
            pl.BlockSpec((1, D), lambda i, h: (0, 0)),
            pl.BlockSpec((1, D), lambda i, h: (0, 0)),
            pl.BlockSpec((D, th_), lambda i, h: (0, h)),
            pl.BlockSpec((1, th_), lambda i, h: (0, h)),
            pl.BlockSpec((th_, D), lambda i, h: (h, 0)),
            pl.BlockSpec((1, D), lambda i, h: (0, 0)),
        ],
        out_specs=pl.BlockSpec((tm_, D), lambda i, h: (i, 0)),
        scratch_shapes=[pltpu.VMEM((tm_, D), jnp.bfloat16),
                        pltpu.VMEM((tm_, D), jnp.float32)],
        compiler_params=pltpu.CompilerParams(
            dimension_semantics=("parallel", "arbitrary")),
    )(xp, g2, bl2, w1p, b1p, w2p, b2p)
    return out[:M]


def _mha_kernel(qkv_ref, o_ref, *, num_heads, scale):
    """All heads of one batch element per grid step.  q/k/v are picked with
    leading-dim static indexing; scores use dot_general (no k transpose) and the
    softmax normalization goes through the EUP reciprocal."""
    for h in range(num_heads):
        q = qkv_ref[0, h]                       # (L, Dh) bf16
        k = qkv_ref[0, num_heads + h]
        v = qkv_ref[0, 2 * num_heads + h]
        s = jax.lax.dot_general(q, k, (((1,), (1,)), ((), ())),
                                preferred_element_type=jnp.float32) * scale
        s = s - jnp.max(s, axis=-1, keepdims=True)
        p = jnp.exp(s)
        p = p * pl.reciprocal(jnp.sum(p, axis=-1, keepdims=True), approx=True)
        o_ref[0, h] = jnp.dot(p.astype(v.dtype), v,
                              preferred_element_type=jnp.float32).astype(o_ref.dtype)


def mha(qkv, batch, seq, num_heads, head_dim):
    """qkv: (B*L, 3*H*Dh) bf16 laid out as [q heads | k heads | v heads]."""
    # TODO(synk): for long sequences (L >= ~1K) switch to a flash-style KV-tiled
    # online-softmax variant; full (L, L) scores are fine at ViT token counts.
    qkv4 = qkv.reshape(batch, seq, 3 * num_heads, head_dim)
    qkv4 = qkv4.transpose(0, 2, 1, 3)           # (B, 3H, L, Dh) — single glue transpose
    scale = 1.0 / (head_dim ** 0.5)
    out = pl.pallas_call(
        functools.partial(_mha_kernel, num_heads=num_heads, scale=scale),
        out_shape=jax.ShapeDtypeStruct((batch, num_heads, seq, head_dim),
                                       jnp.bfloat16),
        grid=(batch,),
        in_specs=[pl.BlockSpec((1, 3 * num_heads, seq, head_dim),
                               lambda b: (b, 0, 0, 0))],
        out_specs=pl.BlockSpec((1, num_heads, seq, head_dim),
                               lambda b: (b, 0, 0, 0)),
        compiler_params=pltpu.CompilerParams(dimension_semantics=("parallel",)),
    )(qkv4)
    return out.transpose(0, 2, 1, 3).reshape(batch, seq, num_heads * head_dim)


# ----------------------------------------------------------------------------
# Model pieces (thin JAX glue around the fused Pallas kernels)
# ----------------------------------------------------------------------------
def transformer_block(x, p, num_heads):
    """Pre-LN ViT block: x + Attn(LN(x)); x + MLP(LN(x)).  x: (B, L, D)."""
    B, L, D = x.shape
    Dh = D // num_heads
    x2 = x.reshape(B * L, D)

    qkv = ln_linear(x2, p["ln1_g"], p["ln1_b"], p["w_qkv"], p["b_qkv"])   # fused LN+QKV
    a = mha(qkv, B, L, num_heads, Dh)                                     # (B, L, D)
    x2 = linear(a.reshape(B * L, D), p["w_proj"], p["b_proj"],
                residual=x2)                                              # fused residual
    x2 = ln_mlp(x2, p["ln2_g"], p["ln2_b"], p["w_fc1"], p["b_fc1"],
                p["w_fc2"], p["b_fc2"])                                   # fused LN+MLP+res
    return x2.reshape(B, L, D)


def aejepa_forward(params, x, cfg):
    """Forward of AEJEPAModel (eval mode).  x: (B, 3, H, W) NCHW float32."""
    B, C, H, W = x.shape
    p = cfg["patch_size"]
    gh, gw = H // p, W // p
    n_img = gh * gw

    # --- patchify (glue; equivalent to stride-p patch-embed conv im2col) ---
    patches = (
        x.reshape(B, C, gh, p, gw, p)
        .transpose(0, 2, 4, 1, 3, 5)
        .reshape(B * n_img, C * p * p)
    )

    # ------------------------ encoder (ViT stand-in) -----------------------
    enc = params["enc"]
    tok = linear(patches, enc["w_patch"], enc["b_patch"])                 # (B*n_img, E_enc)
    tok = tok.reshape(B, n_img, -1).astype(jnp.float32) + enc["pos"][None]
    lat = jnp.broadcast_to(enc["latent"][None], (B,) + enc["latent"].shape)
    seq = jnp.concatenate([tok, lat], axis=1).astype(jnp.bfloat16)        # (B, n_img+L, E_enc)
    seq = transformer_block(seq, enc["block"], cfg["num_heads"])
    h = seq[:, n_img:, :]                                                 # (B, num_latent_tokens, E_enc)

    # quant_conv = nn.Linear(encoder.embed_dim, codebook_embed_dim)  (N padded to 128 lanes)
    Bq, Lq, De = h.shape
    quant = linear(h.reshape(Bq * Lq, De), params["w_quant"], params["b_quant"])
    quant = quant.reshape(Bq, Lq, -1)                                     # (B, L, codebook_embed_dim)

    # emb_loss = (0, 0, 0, 0); info = None   (AEJEPAModel.encode, quantize removed)
    diff = (jnp.float32(0.0), jnp.float32(0.0), jnp.float32(0.0), jnp.float32(0.0))
    info = None

    # ------------------------ decode ---------------------------------------
    # post_quant_conv = nn.Linear(codebook_embed_dim, decoder.embed_dim)
    z = linear(quant.reshape(Bq * Lq, -1), params["w_postq"], params["b_postq"])
    z = z.reshape(Bq, Lq, -1)                                             # (B, L, E_dec)

    dec_p = params["dec"]
    mask = jnp.broadcast_to(dec_p["mask_pos"][None],
                            (B, n_img, z.shape[-1])).astype(jnp.bfloat16)
    dseq = jnp.concatenate([mask, z], axis=1)                             # (B, n_img+L, E_dec)
    dseq = transformer_block(dseq, dec_p["block"], cfg["num_heads"])
    img_tok = dseq[:, :n_img, :]
    pix = linear(img_tok.reshape(B * n_img, -1), dec_p["w_pix"], dec_p["b_pix"],
                 out_dtype=jnp.float32)                                   # (B*n_img, 3*p*p)
    dec = (
        pix.reshape(B, gh, gw, C, p, p)
        .transpose(0, 3, 1, 4, 2, 5)
        .reshape(B, C, H, W)
    )

    # TODO(synk): training-only vit_predictor branch (pred_z) omitted (eval mode).
    return dec, diff, info


# ----------------------------------------------------------------------------
# Deterministic parameter init
# ----------------------------------------------------------------------------
def _block_params(key, dim, mlp_ratio=4):
    ks = jax.random.split(key, 4)
    hid = dim * mlp_ratio
    return {
        "ln1_g": jnp.ones((dim,), jnp.float32),
        "ln1_b": jnp.zeros((dim,), jnp.float32),
        "w_qkv": 0.02 * jax.random.normal(ks[0], (dim, 3 * dim), jnp.float32),
        "b_qkv": jnp.zeros((3 * dim,), jnp.float32),
        "w_proj": 0.02 * jax.random.normal(ks[1], (dim, dim), jnp.float32),
        "b_proj": jnp.zeros((dim,), jnp.float32),
        "ln2_g": jnp.ones((dim,), jnp.float32),
        "ln2_b": jnp.zeros((dim,), jnp.float32),
        "w_fc1": 0.02 * jax.random.normal(ks[2], (dim, hid), jnp.float32),
        "b_fc1": jnp.zeros((hid,), jnp.float32),
        "w_fc2": 0.02 * jax.random.normal(ks[3], (hid, dim), jnp.float32),
        "b_fc2": jnp.zeros((dim,), jnp.float32),
    }


def init_params(key, cfg):
    C, p = 3, cfg["patch_size"]
    n_img = (cfg["image_size"] // p) ** 2
    Eenc, Edec, Dcb = cfg["enc_dim"], cfg["dec_dim"], cfg["codebook_embed_dim"]
    L = cfg["num_latent_tokens"]
    ks = jax.random.split(key, 10)
    return {
        "enc": {
            "w_patch": 0.02 * jax.random.normal(ks[0], (C * p * p, Eenc), jnp.float32),
            "b_patch": jnp.zeros((Eenc,), jnp.float32),
            "pos": 0.02 * jax.random.normal(ks[1], (n_img, Eenc), jnp.float32),
            "latent": 0.02 * jax.random.normal(ks[2], (L, Eenc), jnp.float32),
            "block": _block_params(ks[3], Eenc),
        },
        "w_quant": 0.02 * jax.random.normal(ks[4], (Eenc, Dcb), jnp.float32),
        "b_quant": jnp.zeros((Dcb,), jnp.float32),
        "w_postq": 0.02 * jax.random.normal(ks[5], (Dcb, Edec), jnp.float32),
        "b_postq": jnp.zeros((Edec,), jnp.float32),
        "dec": {
            "mask_pos": 0.02 * jax.random.normal(ks[6], (n_img, Edec), jnp.float32),
            "block": _block_params(ks[7], Edec),
            "w_pix": 0.02 * jax.random.normal(ks[8], (Edec, C * p * p), jnp.float32),
            "b_pix": jnp.zeros((C * p * p,), jnp.float32),
        },
    }


# ----------------------------------------------------------------------------
if __name__ == "__main__":
    cfg = dict(
        image_size=32,          # small stand-in for 256
        patch_size=16,          # enc_patch_size / dec_patch_size
        num_latent_tokens=8,    # small stand-in for 256
        codebook_embed_dim=8,   # ModelArgs.codebook_embed_dim
        enc_dim=128,            # encoder embed dim (stand-in)
        dec_dim=128,            # decoder embed dim (stand-in)
        num_heads=4,
    )

    root = jax.random.PRNGKey(0)
    kx, kp = jax.random.split(root)
    x = jax.random.normal(kx, (2, 3, cfg["image_size"], cfg["image_size"]), jnp.float32)
    params = init_params(kp, cfg)

    fwd = jax.jit(functools.partial(aejepa_forward, cfg=cfg))
    dec, diff, info = fwd(params, x)
    jax.block_until_ready(dec)
    jax.block_until_ready(diff)

    assert dec.shape == x.shape and dec.dtype == jnp.float32
    assert bool(jnp.all(jnp.isfinite(dec)))
    assert len(diff) == 4 and all(float(d) == 0.0 for d in diff)
    assert info is None
    print("KERNEL_OK")
</pallas_src>

<mosaic_0001>
module attributes {stable_mosaic.version = 11 : i64} {
  func.func @_linear_kernel(%arg0: i32, %arg1: i32, %arg2: i32, %arg3: memref<8x384xbf16, #tpu.memory_space<vmem>>, %arg4: memref<384x128xbf16, #tpu.memory_space<vmem>>, %arg5: memref<1x128xf32, #tpu.memory_space<vmem>>, %arg6: memref<8x128xbf16, #tpu.memory_space<vmem>>, %arg7: memref<8x128xf32, #tpu.memory_space<vmem>>) attributes {dimension_semantics = [#tpu.dimension_semantics<parallel>, #tpu.dimension_semantics<parallel>, #tpu.dimension_semantics<arbitrary>], iteration_bounds = array<i64: 1, 1, 2>, scalar_prefetch = 0 : i64, scratch_operands = 1 : i64, tpu.core_type = #tpu.core_type<tc>, window_params = [{transform_indices = @transform_0, window_bounds = array<i64: 8, 384>}, {transform_indices = @transform_1, window_bounds = array<i64: 384, 128>}, {transform_indices = @transform_2, window_bounds = array<i64: 1, 128>}, {transform_indices = @transform_3, window_bounds = array<i64: 8, 128>}]} {
    %c0_i32 = arith.constant 0 : i32
    %0 = arith.cmpi eq, %arg2, %c0_i32 : i32
    %1 = arith.extui %0 : i1 to i32
    %c0_i32_0 = arith.constant 0 : i32
    %2 = arith.cmpi ne, %1, %c0_i32_0 : i32
    scf.if %2 {
      %cst_9 = arith.constant 0.000000e+00 : f32
      %12 = vector.broadcast %cst_9 : f32 to vector<8x128xf32>
      %c0_10 = arith.constant 0 : index
      %c0_11 = arith.constant 0 : index
      %13 = vector.load %arg7[%c0_10, %c0_11] : memref<8x128xf32, #tpu.memory_space<vmem>>, vector<8x128xf32>
      tpu.vector_store %arg7[%c0_10, %c0_11], %12 {strides = array<i32>} : memref<8x128xf32, #tpu.memory_space<vmem>>, vector<8x128xf32>,
    } else {
    }
    %c0 = arith.constant 0 : index
    %c0_1 = arith.constant 0 : index
    %3 = vector.load %arg7[%c0, %c0_1] : memref<8x128xf32, #tpu.memory_space<vmem>>, vector<8x128xf32>
    %c0_2 = arith.constant 0 : index
    %c0_3 = arith.constant 0 : index
    %4 = vector.load %arg3[%c0_2, %c0_3] : memref<8x384xbf16, #tpu.memory_space<vmem>>, vector<8x384xbf16>
    %c0_4 = arith.constant 0 : index
    %c0_5 = arith.constant 0 : index
    %5 = vector.load %arg4[%c0_4, %c0_5] : memref<384x128xbf16, #tpu.memory_space<vmem>>, vector<384x128xbf16>
    %cst = arith.constant dense<0.000000e+00> : vector<8x128xf32>
    %6 = tpu.matmul %4, %5, %cst {dimension_numbers = #tpu.dot_dimension_numbers<[1], [0], [0], [1], [0, 0, 1, 1], [], []>} : vector<8x384xbf16>, vector<384x128xbf16>, vector<8x128xf32> -> vector<8x128xf32>
    %7 = arith.addf %3, %6 : vector<8x128xf32>
    %c0_6 = arith.constant 0 : index
    %c0_7 = arith.constant 0 : index
    %8 = vector.load %arg7[%c0_6, %c0_7] : memref<8x128xf32, #tpu.memory_space<vmem>>, vector<8x128xf32>
    tpu.vector_store %arg7[%c0_6, %c0_7], %7 {strides = array<i32>} : memref<8x128xf32, #tpu.memory_space<vmem>>, vector<8x128xf32>,
    %c1_i32 = arith.constant 1 : i32
    %9 = arith.cmpi eq, %arg2, %c1_i32 : i32
    %10 = arith.extui %9 : i1 to i32
    %c0_i32_8 = arith.constant 0 : i32
    %11 = arith.cmpi ne, %10, %c0_i32_8 : i32
    scf.if %11 {
      %c0_9 = arith.constant 0 : index
      %c0_10 = arith.constant 0 : index
      %12 = vector.load %arg7[%c0_9, %c0_10] : memref<8x128xf32, #tpu.memory_space<vmem>>, vector<8x128xf32>
      %c0_11 = arith.constant 0 : index
      %c0_12 = arith.constant 0 : index
      %13 = vector.load %arg5[%c0_11, %c0_12] : memref<1x128xf32, #tpu.memory_space<vmem>>, vector<1x128xf32>
      %14 = vector.broadcast %13 : vector<1x128xf32> to vector<8x128xf32>
      %15 = arith.addf %12, %14 : vector<8x128xf32>
      %16 = arith.truncf %15 : vector<8x128xf32> to vector<8x128xbf16>
      %c0_13 = arith.constant 0 : index
      %c0_14 = arith.constant 0 : index
      %17 = vector.load %arg6[%c0_13, %c0_14] : memref<8x128xbf16, #tpu.memory_space<vmem>>, vector<8x128xbf16>
      tpu.vector_store %arg6[%c0_13, %c0_14], %16 {strides = array<i32>} : memref<8x128xbf16, #tpu.memory_space<vmem>>, vector<8x128xbf16>,
    } else {
    }
    return
  }
  func.func @transform_0(%arg0: i32, %arg1: i32, %arg2: i32) -> (i32, i32) {
    %c0_i32 = arith.constant 0 : i32
    return %arg0, %arg2 : i32, i32
  }
  func.func @transform_1(%arg0: i32, %arg1: i32, %arg2: i32) -> (i32, i32) {
    %c0_i32 = arith.constant 0 : i32
    return %arg2, %arg1 : i32, i32
  }
  func.func @transform_2(%arg0: i32, %arg1: i32, %arg2: i32) -> (i32, i32) {
    %c0_i32 = arith.constant 0 : i32
    %c0_i32_0 = arith.constant 0 : i32
    return %c0_i32, %arg1 : i32, i32
  }
  func.func @transform_3(%arg0: i32, %arg1: i32, %arg2: i32) -> (i32, i32) {
    %c0_i32 = arith.constant 0 : i32
    return %arg0, %arg1 : i32, i32
  }
}

module attributes {stable_mosaic.version = 11 : i64} {
  func.func @_ln_linear_kernel(%arg0: i32, %arg1: i32, %arg2: memref<24x128xbf16, #tpu.memory_space<vmem>>, %arg3: memref<1x128xf32, #tpu.memory_space<vmem>>, %arg4: memref<1x128xf32, #tpu.memory_space<vmem>>, %arg5: memref<128x128xbf16, #tpu.memory_space<vmem>>, %arg6: memref<1x128xf32, #tpu.memory_space<vmem>>, %arg7: memref<24x128xbf16, #tpu.memory_space<vmem>>) attributes {dimension_semantics = [#tpu.dimension_semantics<parallel>, #tpu.dimension_semantics<parallel>], iteration_bounds = array<i64: 1, 3>, scalar_prefetch = 0 : i64, scratch_operands = 0 : i64, tpu.core_type = #tpu.core_type<tc>, window_params = [{transform_indices = @transform_0, window_bounds = array<i64: 24, 128>}, {pipeline_mode = #tpu.pipeline_mode<synchronous>, transform_indices = @transform_1, window_bounds = array<i64: 1, 128>}, {pipeline_mode = #tpu.pipeline_mode<synchronous>, transform_indices = @transform_2, window_bounds = array<i64: 1, 128>}, {transform_indices = @transform_3, window_bounds = array<i64: 128, 128>}, {transform_indices = @transform_4, window_bounds = array<i64: 1, 128>}, {transform_indices = @transform_5, window_bounds = array<i64: 24, 128>}]} {
    %c0 = arith.constant 0 : index
    %c0_0 = arith.constant 0 : index
    %0 = vector.load %arg2[%c0, %c0_0] : memref<24x128xbf16, #tpu.memory_space<vmem>>, vector<24x128xbf16>
    %1 = arith.extf %0 : vector<24x128xbf16> to vector<24x128xf32>
    %cst = arith.constant dense<0.000000e+00> : vector<24xf32>
    %2 = vector.multi_reduction <add>, %1, %cst [1] : vector<24x128xf32> to vector<24xf32>
    %3 = vector.shape_cast %2 : vector<24xf32> to vector<24x1xf32>
    %cst_1 = arith.constant 1.280000e+02 : f32
    %4 = vector.broadcast %cst_1 : f32 to vector<24x1xf32>
    %5 = arith.divf %3, %4 : vector<24x1xf32>
    %6 = vector.broadcast %5 : vector<24x1xf32> to vector<24x128xf32>
    %7 = arith.subf %1, %6 : vector<24x128xf32>
    %8 = arith.mulf %7, %7 : vector<24x128xf32>
    %cst_2 = arith.constant dense<0.000000e+00> : vector<24xf32>
    %9 = vector.multi_reduction <add>, %8, %cst_2 [1] : vector<24x128xf32> to vector<24xf32>
    %10 = vector.shape_cast %9 : vector<24xf32> to vector<24x1xf32>
    %cst_3 = arith.constant 1.280000e+02 : f32
    %11 = vector.broadcast %cst_3 : f32 to vector<24x1xf32>
    %12 = arith.divf %10, %11 : vector<24x1xf32>
    %13 = vector.broadcast %5 : vector<24x1xf32> to vector<24x128xf32>
    %14 = arith.subf %1, %13 : vector<24x128xf32>
    %cst_4 = arith.constant 9.99999997E-7 : f32
    %15 = vector.broadcast %cst_4 : f32 to vector<24x1xf32>
    %16 = arith.addf %12, %15 : vector<24x1xf32>
    %17 = math.rsqrt %16 : vector<24x1xf32>
    %18 = vector.broadcast %17 : vector<24x1xf32> to vector<24x128xf32>
    %19 = arith.mulf %14, %18 : vector<24x128xf32>
    %c0_5 = arith.constant 0 : index
    %c0_6 = arith.constant 0 : index
    %20 = vector.load %arg3[%c0_5, %c0_6] : memref<1x128xf32, #tpu.memory_space<vmem>>, vector<1x128xf32>
    %21 = vector.broadcast %20 : vector<1x128xf32> to vector<24x128xf32>
    %22 = arith.mulf %19, %21 : vector<24x128xf32>
    %c0_7 = arith.constant 0 : index
    %c0_8 = arith.constant 0 : index
    %23 = vector.load %arg4[%c0_7, %c0_8] : memref<1x128xf32, #tpu.memory_space<vmem>>, vector<1x128xf32>
    %24 = vector.broadcast %23 : vector<1x128xf32> to vector<24x128xf32>
    %25 = arith.addf %22, %24 : vector<24x128xf32>
    %26 = arith.truncf %25 : vector<24x128xf32> to vector<24x128xbf16>
    %c0_9 = arith.constant 0 : index
    %c0_10 = arith.constant 0 : index
    %27 = vector.load %arg5[%c0_9, %c0_10] : memref<128x128xbf16, #tpu.memory_space<vmem>>, vector<128x128xbf16>
    %cst_11 = arith.constant dense<0.000000e+00> : vector<24x128xf32>
    %28 = tpu.matmul %26, %27, %cst_11 {dimension_numbers = #tpu.dot_dimension_numbers<[1], [0], [0], [1], [0, 0, 1, 1], [], []>} : vector<24x128xbf16>, vector<128x128xbf16>, vector<24x128xf32> -> vector<24x128xf32>
    %c0_12 = arith.constant 0 : index
    %c0_13 = arith.constant 0 : index
    %29 = vector.load %arg6[%c0_12, %c0_13] : memref<1x128xf32, #tpu.memory_space<vmem>>, vector<1x128xf32>
    %30 = vector.broadcast %29 : vector<1x128xf32> to vector<24x128xf32>
    %31 = arith.addf %28, %30 : vector<24x128xf32>
    %32 = arith.truncf %31 : vector<24x128xf32> to vector<24x128xbf16>
    %c0_14 = arith.constant 0 : index
    %c0_15 = arith.constant 0 : index
    %33 = vector.load %arg7[%c0_14, %c0_15] : memref<24x128xbf16, #tpu.memory_space<vmem>>, vector<24x128xbf16>
    tpu.vector_store %arg7[%c0_14, %c0_15], %32 {strides = array<i32>} : memref<24x128xbf16, #tpu.memory_space<vmem>>, vector<24x128xbf16>,
    return
  }
  func.func @transform_0(%arg0: i32, %arg1: i32) -> (i32, i32) {
    %c0_i32 = arith.constant 0 : i32
    %c0_i32_0 = arith.constant 0 : i32
    return %arg0, %c0_i32 : i32, i32
  }
  func.func @transform_1(%arg0: i32, %arg1: i32) -> (i32, i32) {
    %c0_i32 = arith.constant 0 : i32
    %c0_i32_0 = arith.constant 0 : i32
    %c0_i32_1 = arith.constant 0 : i32
    return %c0_i32, %c0_i32_0 : i32, i32
  }
  func.func @transform_2(%arg0: i32, %arg1: i32) -> (i32, i32) {
    %c0_i32 = arith.constant 0 : i32
    %c0_i32_0 = arith.constant 0 : i32
    %c0_i32_1 = arith.constant 0 : i32
    return %c0_i32, %c0_i32_0 : i32, i32
  }
  func.func @transform_3(%arg0: i32, %arg1: i32) -> (i32, i32) {
    %c0_i32 = arith.constant 0 : i32
    %c0_i32_0 = arith.constant 0 : i32
    return %c0_i32, %arg1 : i32, i32
  }
  func.func @transform_4(%arg0: i32, %arg1: i32) -> (i32, i32) {
    %c0_i32 = arith.constant 0 : i32
    %c0_i32_0 = arith.constant 0 : i32
    return %c0_i32, %arg1 : i32, i32
  }
  func.func @transform_5(%arg0: i32, %arg1: i32) -> (i32, i32) {
    %c0_i32 = arith.constant 0 : i32
    return %arg0, %arg1 : i32, i32
  }
}

module attributes {stable_mosaic.version = 11 : i64} {
  func.func @_mha_kernel(%arg0: i32, %arg1: memref<1x12x12x32xbf16, #tpu.memory_space<vmem>>, %arg2: memref<1x4x12x32xbf16, #tpu.memory_space<vmem>>) attributes {dimension_semantics = [#tpu.dimension_semantics<parallel>], iteration_bounds = array<i64: 2>, scalar_prefetch = 0 : i64, scratch_operands = 0 : i64, tpu.core_type = #tpu.core_type<tc>, window_params = [{transform_indices = @transform_0, window_bounds = array<i64: 1, 12, 12, 32>}, {transform_indices = @transform_1, window_bounds = array<i64: 1, 4, 12, 32>}]} {
    %c0 = arith.constant 0 : index
    %c0_0 = arith.constant 0 : index
    %c0_1 = arith.constant 0 : index
    %c0_2 = arith.constant 0 : index
    %0 = vector.load %arg1[%c0, %c0_0, %c0_1, %c0_2] : memref<1x12x12x32xbf16, #tpu.memory_space<vmem>>, vector<1x1x12x32xbf16>
    %1 = vector.shape_cast %0 : vector<1x1x12x32xbf16> to vector<12x32xbf16>
    %c0_3 = arith.constant 0 : index
    %c4 = arith.constant 4 : index
    %c0_4 = arith.constant 0 : index
    %c0_5 = arith.constant 0 : index
    %2 = vector.load %arg1[%c0_3, %c4, %c0_4, %c0_5] : memref<1x12x12x32xbf16, #tpu.memory_space<vmem>>, vector<1x1x12x32xbf16>
    %3 = vector.shape_cast %2 : vector<1x1x12x32xbf16> to vector<12x32xbf16>
    %c0_6 = arith.constant 0 : index
    %c8 = arith.constant 8 : index
    %c0_7 = arith.constant 0 : index
    %c0_8 = arith.constant 0 : index
    %4 = vector.load %arg1[%c0_6, %c8, %c0_7, %c0_8] : memref<1x12x12x32xbf16, #tpu.memory_space<vmem>>, vector<1x1x12x32xbf16>
    %5 = vector.shape_cast %4 : vector<1x1x12x32xbf16> to vector<12x32xbf16>
    %cst = arith.constant dense<0.000000e+00> : vector<12x12xf32>
    %6 = tpu.matmul %1, %3, %cst {dimension_numbers = #tpu.dot_dimension_numbers<[1], [1], [0], [0], [0, 0, 1, 0], [], []>} : vector<12x32xbf16>, vector<12x32xbf16>, vector<12x12xf32> -> vector<12x12xf32>
    %cst_9 = arith.constant 0.176776692 : f32
    %7 = vector.broadcast %cst_9 : f32 to vector<12x12xf32>
    %8 = arith.mulf %6, %7 : vector<12x12xf32>
    %cst_10 = arith.constant dense<0xFF800000> : vector<12xf32>
    %9 = vector.multi_reduction <maximumf>, %8, %cst_10 [1] : vector<12x12xf32> to vector<12xf32>
    %10 = vector.shape_cast %9 : vector<12xf32> to vector<12x1xf32>
    %11 = vector.broadcast %10 : vector<12x1xf32> to vector<12x12xf32>
    %12 = arith.subf %8, %11 : vector<12x12xf32>
    %13 = math.exp %12 : vector<12x12xf32>
    %cst_11 = arith.constant dense<0.000000e+00> : vector<12xf32>
    %14 = vector.multi_reduction <add>, %13, %cst_11 [1] : vector<12x12xf32> to vector<12xf32>
    %15 = vector.shape_cast %14 : vector<12xf32> to vector<12x1xf32>
    %16 = tpu.reciprocal %15 {approx = true} : vector<12x1xf32> -> vector<12x1xf32>
    %17 = vector.broadcast %16 : vector<12x1xf32> to vector<12x12xf32>
    %18 = arith.mulf %13, %17 : vector<12x12xf32>
    %19 = arith.truncf %18 : vector<12x12xf32> to vector<12x12xbf16>
    %cst_12 = arith.constant dense<0.000000e+00> : vector<12x32xf32>
    %20 = tpu.matmul %19, %5, %cst_12 {dimension_numbers = #tpu.dot_dimension_numbers<[1], [0], [0], [1], [0, 0, 1, 1], [], []>} : vector<12x12xbf16>, vector<12x32xbf16>, vector<12x32xf32> -> vector<12x32xf32>
    %21 = arith.truncf %20 : vector<12x32xf32> to vector<12x32xbf16>
    %c0_13 = arith.constant 0 : index
    %c0_14 = arith.constant 0 : index
    %c0_15 = arith.constant 0 : index
    %c0_16 = arith.constant 0 : index
    %22 = vector.load %arg2[%c0_13, %c0_14, %c0_15, %c0_16] : memref<1x4x12x32xbf16, #tpu.memory_space<vmem>>, vector<1x1x12x32xbf16>
    %23 = vector.shape_cast %22 : vector<1x1x12x32xbf16> to vector<12x32xbf16>
    %24 = vector.shape_cast %21 : vector<12x32xbf16> to vector<1x1x12x32xbf16>
    tpu.vector_store %arg2[%c0_13, %c0_14, %c0_15, %c0_16], %24 {strides = array<i32>} : memref<1x4x12x32xbf16, #tpu.memory_space<vmem>>, vector<1x1x12x32xbf16>,
    %c0_17 = arith.constant 0 : index
    %c1 = arith.constant 1 : index
    %c0_18 = arith.constant 0 : index
    %c0_19 = arith.constant 0 : index
    %25 = vector.load %arg1[%c0_17, %c1, %c0_18, %c0_19] : memref<1x12x12x32xbf16, #tpu.memory_space<vmem>>, vector<1x1x12x32xbf16>
    %26 = vector.shape_cast %25 : vector<1x1x12x32xbf16> to vector<12x32xbf16>
    %c0_20 = arith.constant 0 : index
    %c5 = arith.constant 5 : index
    %c0_21 = arith.constant 0 : index
    %c0_22 = arith.constant 0 : index
    %27 = vector.load %arg1[%c0_20, %c5, %c0_21, %c0_22] : memref<1x12x12x32xbf16, #tpu.memory_space<vmem>>, vector<1x1x12x32xbf16>
    %28 = vector.shape_cast %27 : vector<1x1x12x32xbf16> to vector<12x32xbf16>
    %c0_23 = arith.constant 0 : index
    %c9 = arith.constant 9 : index
    %c0_24 = arith.constant 0 : index
    %c0_25 = arith.constant 0 : index
    %29 = vector.load %arg1[%c0_23, %c9, %c0_24, %c0_25] : memref<1x12x12x32xbf16, #tpu.memory_space<vmem>>, vector<1x1x12x32xbf16>
    %30 = vector.shape_cast %29 : vector<1x1x12x32xbf16> to vector<12x32xbf16>
    %cst_26 = arith.constant dense<0.000000e+00> : vector<12x12xf32>
    %31 = tpu.matmul %26, %28, %cst_26 {dimension_numbers = #tpu.dot_dimension_numbers<[1], [1], [0], [0], [0, 0, 1, 0], [], []>} : vector<12x32xbf16>, vector<12x32xbf16>, vector<12x12xf32> -> vector<12x12xf32>
    %cst_27 = arith.constant 0.176776692 : f32
    %32 = vector.broadcast %cst_27 : f32 to vector<12x12xf32>
    %33 = arith.mulf %31, %32 : vector<12x12xf32>
    %cst_28 = arith.constant dense<0xFF800000> : vector<12xf32>
    %34 = vector.multi_reduction <maximumf>, %33, %cst_28 [1] : vector<12x12xf32> to vector<12xf32>
    %35 = vector.shape_cast %34 : vector<12xf32> to vector<12x1xf32>
    %36 = vector.broadcast %35 : vector<12x1xf32> to vector<12x12xf32>
    %37 = arith.subf %33, %36 : vector<12x12xf32>
    %38 = math.exp %37 : vector<12x12xf32>
    %cst_29 = arith.constant dense<0.000000e+00> : vector<12xf32>
    %39 = vector.multi_reduction <add>, %38, %cst_29 [1] : vector<12x12xf32> to vector<12xf32>
    %40 = vector.shape_cast %39 : vector<12xf32> to vector<12x1xf32>
    %41 = tpu.reciprocal %40 {approx = true} : vector<12x1xf32> -> vector<12x1xf32>
    %42 = vector.broadcast %41 : vector<12x1xf32> to vector<12x12xf32>
    %43 = arith.mulf %38, %42 : vector<12x12xf32>
    %44 = arith.truncf %43 : vector<12x12xf32> to vector<12x12xbf16>
    %cst_30 = arith.constant dense<0.000000e+00> : vector<12x32xf32>
    %45 = tpu.matmul %44, %30, %cst_30 {dimension_numbers = #tpu.dot_dimension_numbers<[1], [0], [0], [1], [0, 0, 1, 1], [], []>} : vector<12x12xbf16>, vector<12x32xbf16>, vector<12x32xf32> -> vector<12x32xf32>
    %46 = arith.truncf %45 : vector<12x32xf32> to vector<12x32xbf16>
    %c0_31 = arith.constant 0 : index
    %c1_32 = arith.constant 1 : index
    %c0_33 = arith.constant 0 : index
    %c0_34 = arith.constant 0 : index
    %47 = vector.load %arg2[%c0_31, %c1_32, %c0_33, %c0_34] : memref<1x4x12x32xbf16, #tpu.memory_space<vmem>>, vector<1x1x12x32xbf16>
    %48 = vector.shape_cast %47 : vector<1x1x12x32xbf16> to vector<12x32xbf16>
    %49 = vector.shape_cast %46 : vector<12x32xbf16> to vector<1x1x12x32xbf16>
    tpu.vector_store %arg2[%c0_31, %c1_32, %c0_33, %c0_34], %49 {strides = array<i32>} : memref<1x4x12x32xbf16, #tpu.memory_space<vmem>>, vector<1x1x12x32xbf16>,
    %c0_35 = arith.constant 0 : index
    %c2 = arith.constant 2 : index
    %c0_36 = arith.constant 0 : index
    %c0_37 = arith.constant 0 : index
    %50 = vector.load %arg1[%c0_35, %c2, %c0_36, %c0_37] : memref<1x12x12x32xbf16, #tpu.memory_space<vmem>>, vector<1x1x12x32xbf16>
    %51 = vector.shape_cast %50 : vector<1x1x12x32xbf16> to vector<12x32xbf16>
    %c0_38 = arith.constant 0 : index
    %c6 = arith.constant 6 : index
    %c0_39 = arith.constant 0 : index
    %c0_40 = arith.constant 0 : index
    %52 = vector.load %arg1[%c0_38, %c6, %c0_39, %c0_40] : memref<1x12x12x32xbf16, #tpu.memory_space<vmem>>, vector<1x1x12x32xbf16>
    %53 = vector.shape_cast %52 : vector<1x1x12x32xbf16> to vector<12x32xbf16>
    %c0_41 = arith.constant 0 : index
    %c10 = arith.constant 10 : index
    %c0_42 = arith.constant 0 : index
    %c0_43 = arith.constant 0 : index
    %54 = vector.load %arg1[%c0_41, %c10, %c0_42, %c0_43] : memref<1x12x12x32xbf16, #tpu.memory_space<vmem>>, vector<1x1x12x32xbf16>
    %55 = vector.shape_cast %54 : vector<1x1x12x32xbf16> to vector<12x32xbf16>
    %cst_44 = arith.constant dense<0.000000e+00> : vector<12x12xf32>
    %56 = tpu.matmul %51, %53, %cst_44 {dimension_numbers = #tpu.dot_dimension_numbers<[1], [1], [0], [0], [0, 0, 1, 0], [], []>} : vector<12x32xbf16>, vector<12x32xbf16>, vector<12x12xf32> -> vector<12x12xf32>
    %cst_45 = arith.constant 0.176776692 : f32
    %57 = vector.broadcast %cst_45 : f32 to vector<12x12xf32>
    %58 = arith.mulf %56, %57 : vector<12x12xf32>
    %cst_46 = arith.constant dense<0xFF800000> : vector<12xf32>
    %59 = vector.multi_reduction <maximumf>, %58, %cst_46 [1] : vector<12x12xf32> to vector<12xf32>
    %60 = vector.shape_cast %59 : vector<12xf32> to vector<12x1xf32>
    %61 = vector.broadcast %60 : vector<12x1xf32> to vector<12x12xf32>
    %62 = arith.subf %58, %61 : vector<12x12xf32>
    %63 = math.exp %62 : vector<12x12xf32>
    %cst_47 = arith.constant dense<0.000000e+00> : vector<12xf32>
    %64 = vector.multi_reduction <add>, %63, %cst_47 [1] : vector<12x12xf32> to vector<12xf32>
    %65 = vector.shape_cast %64 : vector<12xf32> to vector<12x1xf32>
    %66 = tpu.reciprocal %65 {approx = true} : vector<12x1xf32> -> vector<12x1xf32>
    %67 = vector.broadcast %66 : vector<12x1xf32> to vector<12x12xf32>
    %68 = arith.mulf %63, %67 : vector<12x12xf32>
    %69 = arith.truncf %68 : vector<12x12xf32> to vector<12x12xbf16>
    %cst_48 = arith.constant dense<0.000000e+00> : vector<12x32xf32>
    %70 = tpu.matmul %69, %55, %cst_48 {dimension_numbers = #tpu.dot_dimension_numbers<[1], [0], [0], [1], [0, 0, 1, 1], [], []>} : vector<12x12xbf16>, vector<12x32xbf16>, vector<12x32xf32> -> vector<12x32xf32>
    %71 = arith.truncf %70 : vector<12x32xf32> to vector<12x32xbf16>
    %c0_49 = arith.constant 0 : index
    %c2_50 = arith.constant 2 : index
    %c0_51 = arith.constant 0 : index
    %c0_52 = arith.constant 0 : index
    %72 = vector.load %arg2[%c0_49, %c2_50, %c0_51, %c0_52] : memref<1x4x12x32xbf16, #tpu.memory_space<vmem>>, vector<1x1x12x32xbf16>
    %73 = vector.shape_cast %72 : vector<1x1x12x32xbf16> to vector<12x32xbf16>
    %74 = vector.shape_cast %71 : vector<12x32xbf16> to vector<1x1x12x32xbf16>
    tpu.vector_store %arg2[%c0_49, %c2_50, %c0_51, %c0_52], %74 {strides = array<i32>} : memref<1x4x12x32xbf16, #tpu.memory_space<vmem>>, vector<1x1x12x32xbf16>,
    %c0_53 = arith.constant 0 : index
    %c3 = arith.constant 3 : index
    %c0_54 = arith.constant 0 : index
    %c0_55 = arith.constant 0 : index
    %75 = vector.load %arg1[%c0_53, %c3, %c0_54, %c0_55] : memref<1x12x12x32xbf16, #tpu.memory_space<vmem>>, vector<1x1x12x32xbf16>
    %76 = vector.shape_cast %75 : vector<1x1x12x32xbf16> to vector<12x32xbf16>
    %c0_56 = arith.constant 0 : index
    %c7 = arith.constant 7 : index
    %c0_57 = arith.constant 0 : index
    %c0_58 = arith.constant 0 : index
    %77 = vector.load %arg1[%c0_56, %c7, %c0_57, %c0_58] : memref<1x12x12x32xbf16, #tpu.memory_space<vmem>>, vector<1x1x12x32xbf16>
    %78 = vector.shape_cast %77 : vector<1x1x12x32xbf16> to vector<12x32xbf16>
    %c0_59 = arith.constant 0 : index
    %c11 = arith.constant 11 : index
    %c0_60 = arith.constant 0 : index
    %c0_61 = arith.constant 0 : index
    %79 = vector.load %arg1[%c0_59, %c11, %c0_60, %c0_61] : memref<1x12x12x32xbf16, #tpu.memory_space<vmem>>, vector<1x1x12x32xbf16>
    %80 = vector.shape_cast %79 : vector<1x1x12x32xbf16> to vector<12x32xbf16>
    %cst_62 = arith.constant dense<0.000000e+00> : vector<12x12xf32>
    %81 = tpu.matmul %76, %78, %cst_62 {dimension_numbers = #tpu.dot_dimension_numbers<[1], [1], [0], [0], [0, 0, 1, 0], [], []>} : vector<12x32xbf16>, vector<12x32xbf16>, vector<12x12xf32> -> vector<12x12xf32>
    %cst_63 = arith.constant 0.176776692 : f32
    %82 = vector.broadcast %cst_63 : f32 to vector<12x12xf32>
    %83 = arith.mulf %81, %82 : vector<12x12xf32>
    %cst_64 = arith.constant dense<0xFF800000> : vector<12xf32>
    %84 = vector.multi_reduction <maximumf>, %83, %cst_64 [1] : vector<12x12xf32> to vector<12xf32>
    %85 = vector.shape_cast %84 : vector<12xf32> to vector<12x1xf32>
    %86 = vector.broadcast %85 : vector<12x1xf32> to vector<12x12xf32>
    %87 = arith.subf %83, %86 : vector<12x12xf32>
    %88 = math.exp %87 : vector<12x12xf32>
    %cst_65 = arith.constant dense<0.000000e+00> : vector<12xf32>
    %89 = vector.multi_reduction <add>, %88, %cst_65 [1] : vector<12x12xf32> to vector<12xf32>
    %90 = vector.shape_cast %89 : vector<12xf32> to vector<12x1xf32>
    %91 = tpu.reciprocal %90 {approx = true} : vector<12x1xf32> -> vector<12x1xf32>
    %92 = vector.broadcast %91 : vector<12x1xf32> to vector<12x12xf32>
    %93 = arith.mulf %88, %92 : vector<12x12xf32>
    %94 = arith.truncf %93 : vector<12x12xf32> to vector<12x12xbf16>
    %cst_66 = arith.constant dense<0.000000e+00> : vector<12x32xf32>
    %95 = tpu.matmul %94, %80, %cst_66 {dimension_numbers = #tpu.dot_dimension_numbers<[1], [0], [0], [1], [0, 0, 1, 1], [], []>} : vector<12x12xbf16>, vector<12x32xbf16>, vector<12x32xf32> -> vector<12x32xf32>
    %96 = arith.truncf %95 : vector<12x32xf32> to vector<12x32xbf16>
    %c0_67 = arith.constant 0 : index
    %c3_68 = arith.constant 3 : index
    %c0_69 = arith.constant 0 : index
    %c0_70 = arith.constant 0 : index
    %97 = vector.load %arg2[%c0_67, %c3_68, %c0_69, %c0_70] : memref<1x4x12x32xbf16, #tpu.memory_space<vmem>>, vector<1x1x12x32xbf16>
    %98 = vector.shape_cast %97 : vector<1x1x12x32xbf16> to vector<12x32xbf16>
    %99 = vector.shape_cast %96 : vector<12x32xbf16> to vector<1x1x12x32xbf16>
    tpu.vector_store %arg2[%c0_67, %c3_68, %c0_69, %c0_70], %99 {strides = array<i32>} : memref<1x4x12x32xbf16, #tpu.memory_space<vmem>>, vector<1x1x12x32xbf16>,
    return
  }
  func.func @transform_0(%arg0: i32) -> (i32, i32, i32, i32) {
    %c0_i32 = arith.constant 0 : i32
    %c0_i32_0 = arith.constant 0 : i32
    %c0_i32_1 = arith.constant 0 : i32
    %c0_i32_2 = arith.constant 0 : i32
    return %arg0, %c0_i32, %c0_i32_0, %c0_i32_1 : i32, i32, i32, i32
  }
  func.func @transform_1(%arg0: i32) -> (i32, i32, i32, i32) {
    %c0_i32 = arith.constant 0 : i32
    %c0_i32_0 = arith.constant 0 : i32
    %c0_i32_1 = arith.constant 0 : i32
    %c0_i32_2 = arith.constant 0 : i32
    return %arg0, %c0_i32, %c0_i32_0, %c0_i32_1 : i32, i32, i32, i32
  }
}

module attributes {stable_mosaic.version = 11 : i64} {
  func.func @_linear_kernel(%arg0: i32, %arg1: i32, %arg2: i32, %arg3: memref<24x128xbf16, #tpu.memory_space<vmem>>, %arg4: memref<128x128xbf16, #tpu.memory_space<vmem>>, %arg5: memref<1x128xf32, #tpu.memory_space<vmem>>, %arg6: memref<24x128xbf16, #tpu.memory_space<vmem>>, %arg7: memref<24x128xbf16, #tpu.memory_space<vmem>>, %arg8: memref<24x128xf32, #tpu.memory_space<vmem>>) attributes {dimension_semantics = [#tpu.dimension_semantics<parallel>, #tpu.dimension_semantics<parallel>, #tpu.dimension_semantics<arbitrary>], iteration_bounds = array<i64: 1, 1, 1>, scalar_prefetch = 0 : i64, scratch_operands = 1 : i64, tpu.core_type = #tpu.core_type<tc>, window_params = [{transform_indices = @transform_0, window_bounds = array<i64: 24, 128>}, {transform_indices = @transform_1, window_bounds = array<i64: 128, 128>}, {transform_indices = @transform_2, window_bounds = array<i64: 1, 128>}, {transform_indices = @transform_3, window_bounds = array<i64: 24, 128>}, {transform_indices = @transform_4, window_bounds = array<i64: 24, 128>}]} {
    %c0_i32 = arith.constant 0 : i32
    %0 = arith.cmpi eq, %arg2, %c0_i32 : i32
    %1 = arith.extui %0 : i1 to i32
    %c0_i32_0 = arith.constant 0 : i32
    %2 = arith.cmpi ne, %1, %c0_i32_0 : i32
    scf.if %2 {
      %cst_10 = arith.constant 0.000000e+00 : f32
      %12 = vector.broadcast %cst_10 : f32 to vector<24x128xf32>
      %c0_11 = arith.constant 0 : index
      %c0_12 = arith.constant 0 : index
      %13 = vector.load %arg8[%c0_11, %c0_12] : memref<24x128xf32, #tpu.memory_space<vmem>>, vector<24x128xf32>
      tpu.vector_store %arg8[%c0_11, %c0_12], %12 {strides = array<i32>} : memref<24x128xf32, #tpu.memory_space<vmem>>, vector<24x128xf32>,
    } else {
    }
    %c0 = arith.constant 0 : index
    %c0_1 = arith.constant 0 : index
    %3 = vector.load %arg8[%c0, %c0_1] : memref<24x128xf32, #tpu.memory_space<vmem>>, vector<24x128xf32>
    %c0_2 = arith.constant 0 : index
    %c0_3 = arith.constant 0 : index
    %4 = vector.load %arg3[%c0_2, %c0_3] : memref<24x128xbf16, #tpu.memory_space<vmem>>, vector<24x128xbf16>
    %c0_4 = arith.constant 0 : index
    %c0_5 = arith.constant 0 : index
    %5 = vector.load %arg4[%c0_4, %c0_5] : memref<128x128xbf16, #tpu.memory_space<vmem>>, vector<128x128xbf16>
    %cst = arith.constant dense<0.000000e+00> : vector<24x128xf32>
    %6 = tpu.matmul %4, %5, %cst {dimension_numbers = #tpu.dot_dimension_numbers<[1], [0], [0], [1], [0, 0, 1, 1], [], []>} : vector<24x128xbf16>, vector<128x128xbf16>, vector<24x128xf32> -> vector<24x128xf32>
    %7 = arith.addf %3, %6 : vector<24x128xf32>
    %c0_6 = arith.constant 0 : index
    %c0_7 = arith.constant 0 : index
    %8 = vector.load %arg8[%c0_6, %c0_7] : memref<24x128xf32, #tpu.memory_space<vmem>>, vector<24x128xf32>
    tpu.vector_store %arg8[%c0_6, %c0_7], %7 {strides = array<i32>} : memref<24x128xf32, #tpu.memory_space<vmem>>, vector<24x128xf32>,
    %c0_i32_8 = arith.constant 0 : i32
    %9 = arith.cmpi eq, %arg2, %c0_i32_8 : i32
    %10 = arith.extui %9 : i1 to i32
    %c0_i32_9 = arith.constant 0 : i32
    %11 = arith.cmpi ne, %10, %c0_i32_9 : i32
    scf.if %11 {
      %c0_10 = arith.constant 0 : index
      %c0_11 = arith.constant 0 : index
      %12 = vector.load %arg8[%c0_10, %c0_11] : memref<24x128xf32, #tpu.memory_space<vmem>>, vector<24x128xf32>
      %c0_12 = arith.constant 0 : index
      %c0_13 = arith.constant 0 : index
      %13 = vector.load %arg5[%c0_12, %c0_13] : memref<1x128xf32, #tpu.memory_space<vmem>>, vector<1x128xf32>
      %14 = vector.broadcast %13 : vector<1x128xf32> to vector<24x128xf32>
      %15 = arith.addf %12, %14 : vector<24x128xf32>
      %c0_14 = arith.constant 0 : index
      %c0_15 = arith.constant 0 : index
      %16 = vector.load %arg6[%c0_14, %c0_15] : memref<24x128xbf16, #tpu.memory_space<vmem>>, vector<24x128xbf16>
      %17 = arith.extf %16 : vector<24x128xbf16> to vector<24x128xf32>
      %18 = arith.addf %15, %17 : vector<24x128xf32>
      %19 = arith.truncf %18 : vector<24x128xf32> to vector<24x128xbf16>
      %c0_16 = arith.constant 0 : index
      %c0_17 = arith.constant 0 : index
      %20 = vector.load %arg7[%c0_16, %c0_17] : memref<24x128xbf16, #tpu.memory_space<vmem>>, vector<24x128xbf16>
      tpu.vector_store %arg7[%c0_16, %c0_17], %19 {strides = array<i32>} : memref<24x128xbf16, #tpu.memory_space<vmem>>, vector<24x128xbf16>,
    } else {
    }
    return
  }
  func.func @transform_0(%arg0: i32, %arg1: i32, %arg2: i32) -> (i32, i32) {
    %c0_i32 = arith.constant 0 : i32
    return %arg0, %arg2 : i32, i32
  }
  func.func @transform_1(%arg0: i32, %arg1: i32, %arg2: i32) -> (i32, i32) {
    %c0_i32 = arith.constant 0 : i32
    return %arg2, %arg1 : i32, i32
  }
  func.func @transform_2(%arg0: i32, %arg1: i32, %arg2: i32) -> (i32, i32) {
    %c0_i32 = arith.constant 0 : i32
    %c0_i32_0 = arith.constant 0 : i32
    return %c0_i32, %arg1 : i32, i32
  }
  func.func @transform_3(%arg0: i32, %arg1: i32, %arg2: i32) -> (i32, i32) {
    %c0_i32 = arith.constant 0 : i32
    return %arg0, %arg1 : i32, i32
  }
  func.func @transform_4(%arg0: i32, %arg1: i32, %arg2: i32) -> (i32, i32) {
    %c0_i32 = arith.constant 0 : i32
    return %arg0, %arg1 : i32, i32
  }
}

module attributes {stable_mosaic.version = 11 : i64} {
  func.func @_ln_mlp_kernel(%arg0: i32, %arg1: i32, %arg2: memref<24x128xbf16, #tpu.memory_space<vmem>>, %arg3: memref<1x128xf32, #tpu.memory_space<vmem>>, %arg4: memref<1x128xf32, #tpu.memory_space<vmem>>, %arg5: memref<128x512xbf16, #tpu.memory_space<vmem>>, %arg6: memref<1x512xf32, #tpu.memory_space<vmem>>, %arg7: memref<512x128xbf16, #tpu.memory_space<vmem>>, %arg8: memref<1x128xf32, #tpu.memory_space<vmem>>, %arg9: memref<24x128xbf16, #tpu.memory_space<vmem>>, %arg10: memref<24x128xbf16, #tpu.memory_space<vmem>>, %arg11: memref<24x128xf32, #tpu.memory_space<vmem>>) attributes {dimension_semantics = [#tpu.dimension_semantics<parallel>, #tpu.dimension_semantics<arbitrary>], iteration_bounds = array<i64: 1, 1>, scalar_prefetch = 0 : i64, scratch_operands = 2 : i64, tpu.core_type = #tpu.core_type<tc>, window_params = [{transform_indices = @transform_0, window_bounds = array<i64: 24, 128>}, {pipeline_mode = #tpu.pipeline_mode<synchronous>, transform_indices = @transform_1, window_bounds = array<i64: 1, 128>}, {pipeline_mode = #tpu.pipeline_mode<synchronous>, transform_indices = @transform_2, window_bounds = array<i64: 1, 128>}, {transform_indices = @transform_3, window_bounds = array<i64: 128, 512>}, {transform_indices = @transform_4, window_bounds = array<i64: 1, 512>}, {transform_indices = @transform_5, window_bounds = array<i64: 512, 128>}, {pipeline_mode = #tpu.pipeline_mode<synchronous>, transform_indices = @transform_6, window_bounds = array<i64: 1, 128>}, {transform_indices = @transform_7, window_bounds = array<i64: 24, 128>}]} {
    %c0_i32 = arith.constant 0 : i32
    %0 = arith.cmpi eq, %arg1, %c0_i32 : i32
    %1 = arith.extui %0 : i1 to i32
    %c0_i32_0 = arith.constant 0 : i32
    %2 = arith.cmpi ne, %1, %c0_i32_0 : i32
    scf.if %2 {
      %c0_19 = arith.constant 0 : index
      %c0_20 = arith.constant 0 : index
      %31 = vector.load %arg2[%c0_19, %c0_20] : memref<24x128xbf16, #tpu.memory_space<vmem>>, vector<24x128xbf16>
      %32 = arith.extf %31 : vector<24x128xbf16> to vector<24x128xf32>
      %cst_21 = arith.constant dense<0.000000e+00> : vector<24xf32>
      %33 = vector.multi_reduction <add>, %32, %cst_21 [1] : vector<24x128xf32> to vector<24xf32>
      %34 = vector.shape_cast %33 : vector<24xf32> to vector<24x1xf32>
      %cst_22 = arith.constant 1.280000e+02 : f32
      %35 = vector.broadcast %cst_22 : f32 to vector<24x1xf32>
      %36 = arith.divf %34, %35 : vector<24x1xf32>
      %37 = vector.broadcast %36 : vector<24x1xf32> to vector<24x128xf32>
      %38 = arith.subf %32, %37 : vector<24x128xf32>
      %39 = arith.mulf %38, %38 : vector<24x128xf32>
      %cst_23 = arith.constant dense<0.000000e+00> : vector<24xf32>
      %40 = vector.multi_reduction <add>, %39, %cst_23 [1] : vector<24x128xf32> to vector<24xf32>
      %41 = vector.shape_cast %40 : vector<24xf32> to vector<24x1xf32>
      %cst_24 = arith.constant 1.280000e+02 : f32
      %42 = vector.broadcast %cst_24 : f32 to vector<24x1xf32>
      %43 = arith.divf %41, %42 : vector<24x1xf32>
      %44 = vector.broadcast %36 : vector<24x1xf32> to vector<24x128xf32>
      %45 = arith.subf %32, %44 : vector<24x128xf32>
      %cst_25 = arith.constant 9.99999997E-7 : f32
      %46 = vector.broadcast %cst_25 : f32 to vector<24x1xf32>
      %47 = arith.addf %43, %46 : vector<24x1xf32>
      %48 = math.rsqrt %47 : vector<24x1xf32>
      %49 = vector.broadcast %48 : vector<24x1xf32> to vector<24x128xf32>
      %50 = arith.mulf %45, %49 : vector<24x128xf32>
      %c0_26 = arith.constant 0 : index
      %c0_27 = arith.constant 0 : index
      %51 = vector.load %arg3[%c0_26, %c0_27] : memref<1x128xf32, #tpu.memory_space<vmem>>, vector<1x128xf32>
      %52 = vector.broadcast %51 : vector<1x128xf32> to vector<24x128xf32>
      %53 = arith.mulf %50, %52 : vector<24x128xf32>
      %c0_28 = arith.constant 0 : index
      %c0_29 = arith.constant 0 : index
      %54 = vector.load %arg4[%c0_28, %c0_29] : memref<1x128xf32, #tpu.memory_space<vmem>>, vector<1x128xf32>
      %55 = vector.broadcast %54 : vector<1x128xf32> to vector<24x128xf32>
      %56 = arith.addf %53, %55 : vector<24x128xf32>
      %57 = arith.truncf %56 : vector<24x128xf32> to vector<24x128xbf16>
      %c0_30 = arith.constant 0 : index
      %c0_31 = arith.constant 0 : index
      %58 = vector.load %arg10[%c0_30, %c0_31] : memref<24x128xbf16, #tpu.memory_space<vmem>>, vector<24x128xbf16>
      tpu.vector_store %arg10[%c0_30, %c0_31], %57 {strides = array<i32>} : memref<24x128xbf16, #tpu.memory_space<vmem>>, vector<24x128xbf16>,
      %cst_32 = arith.constant 0.000000e+00 : f32
      %59 = vector.broadcast %cst_32 : f32 to vector<24x128xf32>
      %c0_33 = arith.constant 0 : index
      %c0_34 = arith.constant 0 : index
      %60 = vector.load %arg11[%c0_33, %c0_34] : memref<24x128xf32, #tpu.memory_space<vmem>>, vector<24x128xf32>
      tpu.vector_store %arg11[%c0_33, %c0_34], %59 {strides = array<i32>} : memref<24x128xf32, #tpu.memory_space<vmem>>, vector<24x128xf32>,
    } else {
    }
    %c0 = arith.constant 0 : index
    %c0_1 = arith.constant 0 : index
    %3 = vector.load %arg10[%c0, %c0_1] : memref<24x128xbf16, #tpu.memory_space<vmem>>, vector<24x128xbf16>
    %c0_2 = arith.constant 0 : index
    %c0_3 = arith.constant 0 : index
    %4 = vector.load %arg5[%c0_2, %c0_3] : memref<128x512xbf16, #tpu.memory_space<vmem>>, vector<128x512xbf16>
    %cst = arith.constant dense<0.000000e+00> : vector<24x512xf32>
    %5 = tpu.matmul %3, %4, %cst {dimension_numbers = #tpu.dot_dimension_numbers<[1], [0], [0], [1], [0, 0, 1, 1], [], []>} : vector<24x128xbf16>, vector<128x512xbf16>, vector<24x512xf32> -> vector<24x512xf32>
    %c0_4 = arith.constant 0 : index
    %c0_5 = arith.constant 0 : index
    %6 = vector.load %arg6[%c0_4, %c0_5] : memref<1x512xf32, #tpu.memory_space<vmem>>, vector<1x512xf32>
    %7 = vector.broadcast %6 : vector<1x512xf32> to vector<24x512xf32>
    %8 = arith.addf %5, %7 : vector<24x512xf32>
    %9 = arith.mulf %8, %8 : vector<24x512xf32>
    %10 = arith.mulf %8, %9 : vector<24x512xf32>
    %cst_6 = arith.constant 4.471500e-02 : f32
    %11 = vector.broadcast %cst_6 : f32 to vector<24x512xf32>
    %12 = arith.mulf %11, %10 : vector<24x512xf32>
    %13 = arith.addf %8, %12 : vector<24x512xf32>
    %cst_7 = arith.constant 0.797884583 : f32
    %14 = vector.broadcast %cst_7 : f32 to vector<24x512xf32>
    %15 = arith.mulf %14, %13 : vector<24x512xf32>
    %16 = math.tanh %15 : vector<24x512xf32>
    %cst_8 = arith.constant 1.000000e+00 : f32
    %17 = vector.broadcast %cst_8 : f32 to vector<24x512xf32>
    %18 = arith.addf %17, %16 : vector<24x512xf32>
    %cst_9 = arith.constant 5.000000e-01 : f32
    %19 = vector.broadcast %cst_9 : f32 to vector<24x512xf32>
    %20 = arith.mulf %19, %18 : vector<24x512xf32>
    %21 = arith.mulf %8, %20 : vector<24x512xf32>
    %c0_10 = arith.constant 0 : index
    %c0_11 = arith.constant 0 : index
    %22 = vector.load %arg11[%c0_10, %c0_11] : memref<24x128xf32, #tpu.memory_space<vmem>>, vector<24x128xf32>
    %23 = arith.truncf %21 : vector<24x512xf32> to vector<24x512xbf16>
    %c0_12 = arith.constant 0 : index
    %c0_13 = arith.constant 0 : index
    %24 = vector.load %arg7[%c0_12, %c0_13] : memref<512x128xbf16, #tpu.memory_space<vmem>>, vector<512x128xbf16>
    %cst_14 = arith.constant dense<0.000000e+00> : vector<24x128xf32>
    %25 = tpu.matmul %23, %24, %cst_14 {dimension_numbers = #tpu.dot_dimension_numbers<[1], [0], [0], [1], [0, 0, 1, 1], [], []>} : vector<24x512xbf16>, vector<512x128xbf16>, vector<24x128xf32> -> vector<24x128xf32>
    %26 = arith.addf %22, %25 : vector<24x128xf32>
    %c0_15 = arith.constant 0 : index
    %c0_16 = arith.constant 0 : index
    %27 = vector.load %arg11[%c0_15, %c0_16] : memref<24x128xf32, #tpu.memory_space<vmem>>, vector<24x128xf32>
    tpu.vector_store %arg11[%c0_15, %c0_16], %26 {strides = array<i32>} : memref<24x128xf32, #tpu.memory_space<vmem>>, vector<24x128xf32>,
    %c0_i32_17 = arith.constant 0 : i32
    %28 = arith.cmpi eq, %arg1, %c0_i32_17 : i32
    %29 = arith.extui %28 : i1 to i32
    %c0_i32_18 = arith.constant 0 : i32
    %30 = arith.cmpi ne, %29, %c0_i32_18 : i32
    scf.if %30 {
      %c0_19 = arith.constant 0 : index
      %c0_20 = arith.constant 0 : index
      %31 = vector.load %arg11[%c0_19, %c0_20] : memref<24x128xf32, #tpu.memory_space<vmem>>, vector<24x128xf32>
      %c0_21 = arith.constant 0 : index
      %c0_22 = arith.constant 0 : index
      %32 = vector.load %arg8[%c0_21, %c0_22] : memref<1x128xf32, #tpu.memory_space<vmem>>, vector<1x128xf32>
      %33 = vector.broadcast %32 : vector<1x128xf32> to vector<24x128xf32>
      %34 = arith.addf %31, %33 : vector<24x128xf32>
      %c0_23 = arith.constant 0 : index
      %c0_24 = arith.constant 0 : index
      %35 = vector.load %arg2[%c0_23, %c0_24] : memref<24x128xbf16, #tpu.memory_space<vmem>>, vector<24x128xbf16>
      %36 = arith.extf %35 : vector<24x128xbf16> to vector<24x128xf32>
      %37 = arith.addf %34, %36 : vector<24x128xf32>
      %38 = arith.truncf %37 : vector<24x128xf32> to vector<24x128xbf16>
      %c0_25 = arith.constant 0 : index
      %c0_26 = arith.constant 0 : index
      %39 = vector.load %arg9[%c0_25, %c0_26] : memref<24x128xbf16, #tpu.memory_space<vmem>>, vector<24x128xbf16>
      tpu.vector_store %arg9[%c0_25, %c0_26], %38 {strides = array<i32>} : memref<24x128xbf16, #tpu.memory_space<vmem>>, vector<24x128xbf16>,
    } else {
    }
    return
  }
  func.func @transform_0(%arg0: i32, %arg1: i32) -> (i32, i32) {
    %c0_i32 = arith.constant 0 : i32
    %c0_i32_0 = arith.constant 0 : i32
    return %arg0, %c0_i32 : i32, i32
  }
  func.func @transform_1(%arg0: i32, %arg1: i32) -> (i32, i32) {
    %c0_i32 = arith.constant 0 : i32
    %c0_i32_0 = arith.constant 0 : i32
    %c0_i32_1 = arith.constant 0 : i32
    return %c0_i32, %c0_i32_0 : i32, i32
  }
  func.func @transform_2(%arg0: i32, %arg1: i32) -> (i32, i32) {
    %c0_i32 = arith.constant 0 : i32
    %c0_i32_0 = arith.constant 0 : i32
    %c0_i32_1 = arith.constant 0 : i32
    return %c0_i32, %c0_i32_0 : i32, i32
  }
  func.func @transform_3(%arg0: i32, %arg1: i32) -> (i32, i32) {
    %c0_i32 = arith.constant 0 : i32
    %c0_i32_0 = arith.constant 0 : i32
    return %c0_i32, %arg1 : i32, i32
  }
  func.func @transform_4(%arg0: i32, %arg1: i32) -> (i32, i32) {
    %c0_i32 = arith.constant 0 : i32
    %c0_i32_0 = arith.constant 0 : i32
    return %c0_i32, %arg1 : i32, i32
  }
  func.func @transform_5(%arg0: i32, %arg1: i32) -> (i32, i32) {
    %c0_i32 = arith.constant 0 : i32
    %c0_i32_0 = arith.constant 0 : i32
    return %arg1, %c0_i32 : i32, i32
  }
  func.func @transform_6(%arg0: i32, %arg1: i32) -> (i32, i32) {
    %c0_i32 = arith.constant 0 : i32
    %c0_i32_0 = arith.constant 0 : i32
    %c0_i32_1 = arith.constant 0 : i32
    return %c0_i32, %c0_i32_0 : i32, i32
  }
  func.func @transform_7(%arg0: i32, %arg1: i32) -> (i32, i32) {
    %c0_i32 = arith.constant 0 : i32
    %c0_i32_0 = arith.constant 0 : i32
    return %arg0, %c0_i32 : i32, i32
  }
}

module attributes {stable_mosaic.version = 11 : i64} {
  func.func @_linear_kernel(%arg0: i32, %arg1: i32, %arg2: i32, %arg3: memref<16x128xbf16, #tpu.memory_space<vmem>>, %arg4: memref<128x128xbf16, #tpu.memory_space<vmem>>, %arg5: memref<1x128xf32, #tpu.memory_space<vmem>>, %arg6: memref<16x128xbf16, #tpu.memory_space<vmem>>, %arg7: memref<16x128xf32, #tpu.memory_space<vmem>>) attributes {dimension_semantics = [#tpu.dimension_semantics<parallel>, #tpu.dimension_semantics<parallel>, #tpu.dimension_semantics<arbitrary>], iteration_bounds = array<i64: 1, 1, 1>, scalar_prefetch = 0 : i64, scratch_operands = 1 : i64, tpu.core_type = #tpu.core_type<tc>, window_params = [{transform_indices = @transform_0, window_bounds = array<i64: 16, 128>}, {transform_indices = @transform_1, window_bounds = array<i64: 128, 128>}, {transform_indices = @transform_2, window_bounds = array<i64: 1, 128>}, {transform_indices = @transform_3, window_bounds = array<i64: 16, 128>}]} {
    %c0_i32 = arith.constant 0 : i32
    %0 = arith.cmpi eq, %arg2, %c0_i32 : i32
    %1 = arith.extui %0 : i1 to i32
    %c0_i32_0 = arith.constant 0 : i32
    %2 = arith.cmpi ne, %1, %c0_i32_0 : i32
    scf.if %2 {
      %cst_10 = arith.constant 0.000000e+00 : f32
      %12 = vector.broadcast %cst_10 : f32 to vector<16x128xf32>
      %c0_11 = arith.constant 0 : index
      %c0_12 = arith.constant 0 : index
      %13 = vector.load %arg7[%c0_11, %c0_12] : memref<16x128xf32, #tpu.memory_space<vmem>>, vector<16x128xf32>
      tpu.vector_store %arg7[%c0_11, %c0_12], %12 {strides = array<i32>} : memref<16x128xf32, #tpu.memory_space<vmem>>, vector<16x128xf32>,
    } else {
    }
    %c0 = arith.constant 0 : index
    %c0_1 = arith.constant 0 : index
    %3 = vector.load %arg7[%c0, %c0_1] : memref<16x128xf32, #tpu.memory_space<vmem>>, vector<16x128xf32>
    %c0_2 = arith.constant 0 : index
    %c0_3 = arith.constant 0 : index
    %4 = vector.load %arg3[%c0_2, %c0_3] : memref<16x128xbf16, #tpu.memory_space<vmem>>, vector<16x128xbf16>
    %c0_4 = arith.constant 0 : index
    %c0_5 = arith.constant 0 : index
    %5 = vector.load %arg4[%c0_4, %c0_5] : memref<128x128xbf16, #tpu.memory_space<vmem>>, vector<128x128xbf16>
    %cst = arith.constant dense<0.000000e+00> : vector<16x128xf32>
    %6 = tpu.matmul %4, %5, %cst {dimension_numbers = #tpu.dot_dimension_numbers<[1], [0], [0], [1], [0, 0, 1, 1], [], []>} : vector<16x128xbf16>, vector<128x128xbf16>, vector<16x128xf32> -> vector<16x128xf32>
    %7 = arith.addf %3, %6 : vector<16x128xf32>
    %c0_6 = arith.constant 0 : index
    %c0_7 = arith.constant 0 : index
    %8 = vector.load %arg7[%c0_6, %c0_7] : memref<16x128xf32, #tpu.memory_space<vmem>>, vector<16x128xf32>
    tpu.vector_store %arg7[%c0_6, %c0_7], %7 {strides = array<i32>} : memref<16x128xf32, #tpu.memory_space<vmem>>, vector<16x128xf32>,
    %c0_i32_8 = arith.constant 0 : i32
    %9 = arith.cmpi eq, %arg2, %c0_i32_8 : i32
    %10 = arith.extui %9 : i1 to i32
    %c0_i32_9 = arith.constant 0 : i32
    %11 = arith.cmpi ne, %10, %c0_i32_9 : i32
    scf.if %11 {
      %c0_10 = arith.constant 0 : index
      %c0_11 = arith.constant 0 : index
      %12 = vector.load %arg7[%c0_10, %c0_11] : memref<16x128xf32, #tpu.memory_space<vmem>>, vector<16x128xf32>
      %c0_12 = arith.constant 0 : index
      %c0_13 = arith.constant 0 : index
      %13 = vector.load %arg5[%c0_12, %c0_13] : memref<1x128xf32, #tpu.memory_space<vmem>>, vector<1x128xf32>
      %14 = vector.broadcast %13 : vector<1x128xf32> to vector<16x128xf32>
      %15 = arith.addf %12, %14 : vector<16x128xf32>
      %16 = arith.truncf %15 : vector<16x128xf32> to vector<16x128xbf16>
      %c0_14 = arith.constant 0 : index
      %c0_15 = arith.constant 0 : index
      %17 = vector.load %arg6[%c0_14, %c0_15] : memref<16x128xbf16, #tpu.memory_space<vmem>>, vector<16x128xbf16>
      tpu.vector_store %arg6[%c0_14, %c0_15], %16 {strides = array<i32>} : memref<16x128xbf16, #tpu.memory_space<vmem>>, vector<16x128xbf16>,
    } else {
    }
    return
  }
  func.func @transform_0(%arg0: i32, %arg1: i32, %arg2: i32) -> (i32, i32) {
    %c0_i32 = arith.constant 0 : i32
    return %arg0, %arg2 : i32, i32
  }
  func.func @transform_1(%arg0: i32, %arg1: i32, %arg2: i32) -> (i32, i32) {
    %c0_i32 = arith.constant 0 : i32
    return %arg2, %arg1 : i32, i32
  }
  func.func @transform_2(%arg0: i32, %arg1: i32, %arg2: i32) -> (i32, i32) {
    %c0_i32 = arith.constant 0 : i32
    %c0_i32_0 = arith.constant 0 : i32
    return %c0_i32, %arg1 : i32, i32
  }
  func.func @transform_3(%arg0: i32, %arg1: i32, %arg2: i32) -> (i32, i32) {
    %c0_i32 = arith.constant 0 : i32
    return %arg0, %arg1 : i32, i32
  }
}

module attributes {stable_mosaic.version = 11 : i64} {
  func.func @_linear_kernel(%arg0: i32, %arg1: i32, %arg2: i32, %arg3: memref<8x128xbf16, #tpu.memory_space<vmem>>, %arg4: memref<128x256xbf16, #tpu.memory_space<vmem>>, %arg5: memref<1x256xf32, #tpu.memory_space<vmem>>, %arg6: memref<8x256xf32, #tpu.memory_space<vmem>>, %arg7: memref<8x256xf32, #tpu.memory_space<vmem>>) attributes {dimension_semantics = [#tpu.dimension_semantics<parallel>, #tpu.dimension_semantics<parallel>, #tpu.dimension_semantics<arbitrary>], iteration_bounds = array<i64: 1, 3, 1>, scalar_prefetch = 0 : i64, scratch_operands = 1 : i64, tpu.core_type = #tpu.core_type<tc>, window_params = [{transform_indices = @transform_0, window_bounds = array<i64: 8, 128>}, {transform_indices = @transform_1, window_bounds = array<i64: 128, 256>}, {transform_indices = @transform_2, window_bounds = array<i64: 1, 256>}, {transform_indices = @transform_3, window_bounds = array<i64: 8, 256>}]} {
    %c0_i32 = arith.constant 0 : i32
    %0 = arith.cmpi eq, %arg2, %c0_i32 : i32
    %1 = arith.extui %0 : i1 to i32
    %c0_i32_0 = arith.constant 0 : i32
    %2 = arith.cmpi ne, %1, %c0_i32_0 : i32
    scf.if %2 {
      %cst_10 = arith.constant 0.000000e+00 : f32
      %12 = vector.broadcast %cst_10 : f32 to vector<8x256xf32>
      %c0_11 = arith.constant 0 : index
      %c0_12 = arith.constant 0 : index
      %13 = vector.load %arg7[%c0_11, %c0_12] : memref<8x256xf32, #tpu.memory_space<vmem>>, vector<8x256xf32>
      tpu.vector_store %arg7[%c0_11, %c0_12], %12 {strides = array<i32>} : memref<8x256xf32, #tpu.memory_space<vmem>>, vector<8x256xf32>,
    } else {
    }
    %c0 = arith.constant 0 : index
    %c0_1 = arith.constant 0 : index
    %3 = vector.load %arg7[%c0, %c0_1] : memref<8x256xf32, #tpu.memory_space<vmem>>, vector<8x256xf32>
    %c0_2 = arith.constant 0 : index
    %c0_3 = arith.constant 0 : index
    %4 = vector.load %arg3[%c0_2, %c0_3] : memref<8x128xbf16, #tpu.memory_space<vmem>>, vector<8x128xbf16>
    %c0_4 = arith.constant 0 : index
    %c0_5 = arith.constant 0 : index
    %5 = vector.load %arg4[%c0_4, %c0_5] : memref<128x256xbf16, #tpu.memory_space<vmem>>, vector<128x256xbf16>
    %cst = arith.constant dense<0.000000e+00> : vector<8x256xf32>
    %6 = tpu.matmul %4, %5, %cst {dimension_numbers = #tpu.dot_dimension_numbers<[1], [0], [0], [1], [0, 0, 1, 1], [], []>} : vector<8x128xbf16>, vector<128x256xbf16>, vector<8x256xf32> -> vector<8x256xf32>
    %7 = arith.addf %3, %6 : vector<8x256xf32>
    %c0_6 = arith.constant 0 : index
    %c0_7 = arith.constant 0 : index
    %8 = vector.load %arg7[%c0_6, %c0_7] : memref<8x256xf32, #tpu.memory_space<vmem>>, vector<8x256xf32>
    tpu.vector_store %arg7[%c0_6, %c0_7], %7 {strides = array<i32>} : memref<8x256xf32, #tpu.memory_space<vmem>>, vector<8x256xf32>,
    %c0_i32_8 = arith.constant 0 : i32
    %9 = arith.cmpi eq, %arg2, %c0_i32_8 : i32
    %10 = arith.extui %9 : i1 to i32
    %c0_i32_9 = arith.constant 0 : i32
    %11 = arith.cmpi ne, %10, %c0_i32_9 : i32
    scf.if %11 {
      %c0_10 = arith.constant 0 : index
      %c0_11 = arith.constant 0 : index
      %12 = vector.load %arg7[%c0_10, %c0_11] : memref<8x256xf32, #tpu.memory_space<vmem>>, vector<8x256xf32>
      %c0_12 = arith.constant 0 : index
      %c0_13 = arith.constant 0 : index
      %13 = vector.load %arg5[%c0_12, %c0_13] : memref<1x256xf32, #tpu.memory_space<vmem>>, vector<1x256xf32>
      %14 = vector.broadcast %13 : vector<1x256xf32> to vector<8x256xf32>
      %15 = arith.addf %12, %14 : vector<8x256xf32>
      %c0_14 = arith.constant 0 : index
      %c0_15 = arith.constant 0 : index
      %16 = vector.load %arg6[%c0_14, %c0_15] : memref<8x256xf32, #tpu.memory_space<vmem>>, vector<8x256xf32>
      tpu.vector_store %arg6[%c0_14, %c0_15], %15 {strides = array<i32>} : memref<8x256xf32, #tpu.memory_space<vmem>>, vector<8x256xf32>,
    } else {
    }
    return
  }
  func.func @transform_0(%arg0: i32, %arg1: i32, %arg2: i32) -> (i32, i32) {
    %c0_i32 = arith.constant 0 : i32
    return %arg0, %arg2 : i32, i32
  }
  func.func @transform_1(%arg0: i32, %arg1: i32, %arg2: i32) -> (i32, i32) {
    %c0_i32 = arith.constant 0 : i32
    return %arg2, %arg1 : i32, i32
  }
  func.func @transform_2(%arg0: i32, %arg1: i32, %arg2: i32) -> (i32, i32) {
    %c0_i32 = arith.constant 0 : i32
    %c0_i32_0 = arith.constant 0 : i32
    return %c0_i32, %arg1 : i32, i32
  }
  func.func @transform_3(%arg0: i32, %arg1: i32, %arg2: i32) -> (i32, i32) {
    %c0_i32 = arith.constant 0 : i32
    return %arg0, %arg1 : i32, i32
  }
}

</mosaic_0001>

<bundles_post_ra>
// kernel: aejepa_forward.12
= control target key start
LH: loop header
LB: loop body
LE: loop exit
PB: predicated region body
PF: predicated region fallthrough
CT: control target
= control target key end

     0   :  { %s865_s12 = smov 0   ;;  %s867_s13 = smov 0   ;;  %s940_s0 = inlined_call_operand.vmem [shape: bf16[8,768], index: 0, kind: input, shape index: {}]   ;;  %s941_s1 = inlined_call_operand.vmem [shape: bf16[768,128], index: 1, kind: input, shape index: {}]   ;;  %s942_s2 = inlined_call_operand.vmem [shape: f32[1,128], index: 2, kind: input, shape index: {}]   ;;  %s943_s3 = inlined_call_operand.vmem [shape: bf16[8,128], index: 3, kind: output, shape index: {}]  }
   0x1   :  { %s869_s14 = smov 0  }
   0x2 LB: > { %s25_s15 = sadd.s32 1, %s836_s13  ;;  %p677_p0 = scmp.ge.s32.totalorder %s840_s14, 1  ;;  %s840_s14 = sphi %s869_s14, %s13_s14   ;;  %s836_s13 = sphi %s867_s13, %s945_s13   ;;  %s832_s12 = sphi %s865_s12, %s944_s12  }
   0x3   : > { %p26_p1 = scmp.ge.s32.totalorder %s25_s15, 2  ;;  %p189_p2 = scmp.lt.s32.totalorder %s840_s14, 3 }
   0x5   : > { %s947_s15 = smov (%p26_p1, %s25_s15), 0  ;;  %p190_p3 = pnand %p677_p0, %p189_p2 }
   0x6   : > { %s230_s16 = smul.u32 (!%p190_p3), 3, %s832_s12  ;;  %p680_p6 = scmp.ne.s32.totalorder (!%p190_p3), %s832_s12, 0 }
   0x7   : > { %193 = sbr.rel (%p190_p3) target bundleno = 289 (0x121), region = 32 }
   0x8   : > { %s240_s17 = smul.u32 (!%p190_p3), 48, %s832_s12  ;;  %p233_p4 = scmp.lt.s32.totalorder (!%p190_p3), %s230_s16, 5 }
   0xa   : > { %p241_p5 = scmp.lt.s32.totalorder (!%p190_p3), %s240_s17, 95 }
   0xe   : > { %s949_s16 = smov (!%p233_p4, %s230_s16), 5  ;;  %s951_s17 = smov (!%p241_p5, %s240_s17), 95 }
   0xf   : > { %s678_s18 = sshll.u32 %s949_s16, 2  ;;  %s679_s22 = sshll.u32 %s951_s17, 2  ;;  %v842_v0 = vmov (!%p680_p6), 0.0  }
  0x10   : > { %s890_s21 = scalar_lea.vmem %s940_s0, %s678_s18  ;;  %s895_s25 = scalar_lea.vmem %s941_s1, %s679_s22  ;;  %264 = vst [vmem:[#allocation2] sm:$0xff] (!%p680_p6), %v842_v0 }
  0x11   : > { %263 = sbr.rel (%p680_p6) target bundleno = 24 (0x18), region = 36 }
  0x18 PF: > { %v791_v1 = vld [vmem:[%s895_s25 + $0x40] sm:$0xff]   ;;  %v843_v2 = vmov 0.0   ;;  %vm844_vm0 = vmmov 0   ;;  %v794_v5 = vld [vmem:[%s895_s25 + $0x48] sm:$0xff]   ;;  %v797_v8 = vld [vmem:[%s895_s25 + $0x50] sm:$0xff]   ;;  %p708_p7 = scmp.ne.s32.totalorder %s832_s12, 1 }
  0x19   : > { %744 = vmatprep.subr.bf16.mxu1 %v843_v2  ;;  %v792_v3 = vld [vmem:[%s895_s25] sm:$0xff]   ;;  %713 = vmatprep.subr.bf16.mxu0 %v791_v1  ;;  %v795_v6 = vld [vmem:[%s895_s25 + $0x8] sm:$0xff]   ;;  %v798_v9 = vld [vmem:[%s895_s25 + $0x10] sm:$0xff]  }
  0x1a   : > { %v793_v4 = vld [vmem:[%s895_s25 + $0x80] sm:$0xff]   ;;  %760 = vmatprep.mubr.msk.bf16.mxu1 %vm844_vm0, %v843_v2  ;;  %714 = vmatpush3.bf16.msra.mxu0 %v792_v3  ;;  %v796_v7 = vld [vmem:[%s895_s25 + $0x88] sm:$0xff]   ;;  %v799_v10 = vld [vmem:[%s895_s25 + $0x90] sm:$0xff]  }
  0x1b   : > { %745 = vmatpush3.bf16.msra.mxu1 %v793_v4  ;;  %715 = vmatprep.subr.bf16.mxu0 %v794_v5  ;;  %v800_v11 = vld [vmem:[%s895_s25 + $0x58] sm:$0xff]   ;;  %v803_v14 = vld [vmem:[%s895_s25 + $0x60] sm:$0xff]   ;;  %v806_v17 = vld [vmem:[%s895_s25 + $0x68] sm:$0xff]  }
  0x1c   : > { %746 = vmatprep.subr.bf16.mxu1 %v843_v2  ;;  %v801_v12 = vld [vmem:[%s895_s25 + $0x18] sm:$0xff]   ;;  %v804_v15 = vld [vmem:[%s895_s25 + $0x20] sm:$0xff]   ;;  %v807_v18 = vld [vmem:[%s895_s25 + $0x28] sm:$0xff]  }
  0x1d   : > { %v802_v13 = vld [vmem:[%s895_s25 + $0x98] sm:$0xff]   ;;  %v805_v16 = vld [vmem:[%s895_s25 + $0xa0] sm:$0xff]   ;;  %v808_v19 = vld [vmem:[%s895_s25 + $0xa8] sm:$0xff]  }
  0x1e   : > { %716 = vmatpush3.bf16.msra.mxu0 %v795_v6  ;;  %v809_v20 = vld [vmem:[%s895_s25 + $0x70] sm:$0xff]   ;;  %v812_v23 = vld [vmem:[%s895_s25 + $0x78] sm:$0xff]   ;;  %v266_v24 = vld [vmem:[%s890_s21] sm:$0xff] }
  0x1f   : > { %747 = vmatpush3.bf16.msra.mxu1 %v796_v7  ;;  %717 = vmatprep.subr.bf16.mxu0 %v797_v8  ;;  %v810_v21 = vld [vmem:[%s895_s25 + $0x30] sm:$0xff]   ;;  %v682_v25 = vcombine.high %v266_v24, %v266_v24  ;;  %v813_v26 = vld [vmem:[%s895_s25 + $0x38] sm:$0xff]   ;;  %v681_v28 = vcombine.low %v266_v24, %v266_v24  ;;  %v817_v29 = vld [vmem:[%s890_s21 + $0x8] ss:$0 sps:$4 sm:$0xff]  }
  0x20   : > { %748 = vmatprep.subr.bf16.mxu1 %v843_v2  ;;  %v811_v22 = vld [vmem:[%s895_s25 + $0xb0] sm:$0xff]   ;;  %v814_v27 = vld [vmem:[%s895_s25 + $0xb8] sm:$0xff]   ;;  %v265_v36 = vld [vmem:[#allocation2] sm:$0xff] }
  0x21   : > { %503 = vmatprep.mubr.bf16.mxu0 %v682_v25  ;;  %v709_v43 = vld [vmem:[%s942_s2] ss:$0 sm:$0xff] (!%p708_p7) }
  0x22   : > { %718 = vmatpush3.bf16.msra.mxu0 %v798_v9 }
  0x23   : > { %749 = vmatpush3.bf16.msra.mxu1 %v799_v10  ;;  %719 = vmatprep.subr.bf16.mxu0 %v800_v11 }
  0x24   : > { %750 = vmatprep.subr.bf16.mxu1 %v843_v2 }
  0x26   : > { %720 = vmatpush3.bf16.msra.mxu0 %v801_v12 }
  0x27   : > { %751 = vmatpush3.bf16.msra.mxu1 %v802_v13  ;;  %721 = vmatprep.subr.bf16.mxu0 %v803_v14 }
  0x28   : > { %752 = vmatprep.subr.bf16.mxu1 %v843_v2 }
  0x2a   : > { %722 = vmatpush3.bf16.msra.mxu0 %v804_v15 }
  0x2b   : > { %753 = vmatpush3.bf16.msra.mxu1 %v805_v16  ;;  %723 = vmatprep.subr.bf16.mxu0 %v806_v17 }
  0x2c   : > { %754 = vmatprep.subr.bf16.mxu1 %v843_v2 }
  0x2e   : > { %724 = vmatpush3.bf16.msra.mxu0 %v807_v18 }
  0x2f   : > { %755 = vmatpush3.bf16.msra.mxu1 %v808_v19  ;;  %725 = vmatprep.subr.bf16.mxu0 %v809_v20 }
  0x30   : > { %756 = vmatprep.subr.bf16.mxu1 %v843_v2 }
  0x32   : > { %726 = vmatpush3.bf16.msra.mxu0 %v810_v21 }
  0x33   : > { %757 = vmatpush3.bf16.msra.mxu1 %v811_v22  ;;  %727 = vmatprep.subr.bf16.mxu0 %v812_v23 }
  0x34   : > { %758 = vmatprep.subr.bf16.mxu1 %v843_v2 }
  0x36   : > { %728 = vmatpush3.bf16.msra.mxu0 %v813_v26 }
  0x37   : > { %759 = vmatpush3.bf16.msra.mxu1 %v814_v27 }
  0x39   : > { %504 = vmatmul.mubr.bf16.vlgmr.msra.gmra.mrb[0].mxu0 %v681_v28 }
  0x3a   : > { %761 = vmatmul.mubr.bf16.vlgmr.msra.gmra.mrb[0].mxu1 %v817_v29 }
 0x10c   : > { %v729_v30 = vpop.f32.mrb[0].mxu0 }
 0x10d   : > { %v545_v31 = vpop.f32.mrb[0].mxu1  ;;  %v730_v32 = vpop.f32.mrb[1].mxu0 }
 0x10e   : > { %v731_v33 = vadd.f32 %v730_v32, %v729_v30  ;;  %v762_v34 = vpop.f32.mrb[1].mxu1  ;;  %v732_v35 = vpop.f32.mrb[2].mxu0  ;;  %556 = sbr.rel (%p708_p7) target bundleno = 289 (0x121), region = 40 }
 0x10f   : > { %v548_v37 = vpop.f32.mrb[2].mxu1  ;;  %v733_v38 = vpop.f32.mrb[3].mxu0 }
 0x110   : > { %v546_v39 = vadd.f32 %v731_v33, %v545_v31  ;;  %v763_v40 = vpop.f32.mrb[3].mxu1 }
 0x112   : > { %v551_v41 = vadd.f32 %v546_v39, %v265_v36 }
 0x114   : > { %552 = vst [vmem:[#allocation2] sm:$0xff] %v551_v41 }
 0x11b   : > { %v557_v42 = vld [vmem:[#allocation2] sm:$0xff] }
 0x11c   : > { %v565_v44 = vadd.f32 %v709_v43, %v557_v42 }
 0x11e   : > { %v566_v45 = vpack.c.bf16 %v565_v44, %v565_v44 }
 0x120   : > { %567 = vst [vmem:[%s943_s3] sm:$0xf] %v566_v45 }
 0x121 PF: > { %s13_s14 = sadd.s32 1, %s840_s14   ;;  %s944_s12 = smov %s836_s13 }
 0x122   : > { %p10_p8 = scmp.ge.s32.totalorder %s13_s14, 4   ;;  %s945_s13 = smov %s947_s15 }
 0x124   :  { %12 = sbr.rel (!%p10_p8) target bundleno = 2 (0x2), region = 76 }

// kernel: aejepa_forward.13
= control target key start
LH: loop header
LB: loop body
LE: loop exit
PB: predicated region body
PF: predicated region fallthrough
CT: control target
= control target key end

     0   :  { %s912_s18 = smov 0   ;;  %s914_s19 = smov 0   ;;  %s1033_s0 = inlined_call_operand.vmem [shape: bf16[24,128], index: 0, kind: input, shape index: {}]   ;;  %s1034_s1 = inlined_call_operand.vmem [shape: f32[1,128], index: 1, kind: input, shape index: {}]   ;;  %s1035_s2 = inlined_call_operand.vmem [shape: f32[1,128], index: 2, kind: input, shape index: {}]   ;;  %s1036_s3 = inlined_call_operand.vmem [shape: bf16[128,384], index: 3, kind: input, shape index: {}]   ;;  %s1037_s4 = inlined_call_operand.vmem [shape: f32[1,384], index: 4, kind: input, shape index: {}]   ;;  %s1038_s5 = inlined_call_operand.vmem [shape: bf16[24,384], index: 5, kind: output, shape index: {}]  }
   0x1   :  { %s916_s20 = smov 0   ;;  %s918_s21 = smov 0  }
   0x2   :  { %s920_s22 = smov 0  }
   0x3 LB: > { %s24_s23 = sadd.s32 1, %s876_s21  ;;  %s719_s24 = sadd.s32 4294967295, %s880_s22   ;;  %s880_s22 = sphi %s920_s22, %s15_s22   ;;  %s876_s21 = sphi %s918_s21, %s1043_s21   ;;  %s872_s20 = sphi %s916_s20, %s1042_s20   ;;  %s868_s19 = sphi %s914_s19, %s1041_s19   ;;  %s864_s18 = sphi %s912_s18, %s1040_s18  }
   0x4   : > { %p25_p0 = scmp.ge.s32.totalorder %s24_s23, 3  ;;  %p109_p1 = scmp.ne.s32.totalorder %s868_s19, %s864_s18 }
   0x5   : > { %p110_p2 = scmp.eq.s32.totalorder %s880_s22, 0  ;;  %p167_p4 = scmp.eq.s32.totalorder %s719_s24, 2 }
   0x6   : > { %s1045_s23 = smov (%p25_p0, %s24_s23), 0  ;;  %s102_s26 = sadd.s32 1, %s868_s19 }
   0x7   : > { %p111_p3 = por %p110_p2, %p109_p1  ;;  %s99_s25 = ssub.s32 %s876_s21, %s1045_s23 }
   0x8   : > { %p100_p5 = scmp.eq.s32.totalorder %s99_s25, 0  ;;  %p947_p6 = por %p167_p4, %p109_p1 }
   0x9   : > { %p723_p7 = scmp.ge.s32.totalorder %s880_s22, 3 }
   0xa   : > { %s952_s28 = scalar_select %p100_p5, %s868_s19, %s102_s26  }
   0xb   : > { %204 = sbr.rel (%p723_p7) target bundleno = 32 (0x20), region = 28 }
  0x12   : > { %207 = sbr.rel (!%p111_p3) target bundleno = 32 (0x20), region = 32  ;;  %s209_s29 = sand.u32 (%p111_p3), 1, %s868_s19  }
  0x13   : > { %s725_s30 = sshll.u32 (%p111_p3), %s876_s21, 2  ;;  %s724_s6 = sshll.u32 (%p111_p3), %s209_s29, 6 }
  0x14   : > { %s960_s9 = scalar_lea.vmem (%p111_p3), %s1036_s3, %s725_s30  ;;  %s211_s10 = scalar_lea.vmem (%p111_p3), [#allocation2], %s724_s6 }
  0x15   : > { %v229_v0 = vld [vmem:[%s960_s9] sm:$0xf] (%p111_p3)  ;;  %v231_v1 = vld [vmem:[%s960_s9 + $0xc] sm:$0xf] (%p111_p3)  ;;  %v233_v2 = vld [vmem:[%s960_s9 + $0x18] sm:$0xf] (%p111_p3) }
  0x16   : > { %230 = vst [vmem:[%s211_s10] sm:$0xf] (%p111_p3), %v229_v0  ;;  %232 = vst [vmem:[%s211_s10 + $0x4] sm:$0xf] (%p111_p3), %v231_v1  ;;  %v235_v3 = vld [vmem:[%s960_s9 + $0x24] sm:$0xf] (%p111_p3) }
  0x17   : > { %v237_v4 = vld [vmem:[%s960_s9 + $0x30] sm:$0xf] (%p111_p3)  ;;  %234 = vst [vmem:[%s211_s10 + $0x8] sm:$0xf] (%p111_p3), %v233_v2  ;;  %236 = vst [vmem:[%s211_s10 + $0xc] sm:$0xf] (%p111_p3), %v235_v3 }
  0x18   : > { %238 = vst [vmem:[%s211_s10 + $0x10] sm:$0xf] (%p111_p3), %v237_v4  ;;  %v239_v5 = vld [vmem:[%s960_s9 + $0x3c] sm:$0xf] (%p111_p3)  ;;  %v241_v6 = vld [vmem:[%s960_s9 + $0x48] sm:$0xf] (%p111_p3) }
  0x19   : > { %v243_v7 = vld [vmem:[%s960_s9 + $0x54] sm:$0xf]  ;;  %240 = vst [vmem:[%s211_s10 + $0x14] sm:$0xf] %v239_v5  ;;  %242 = vst [vmem:[%s211_s10 + $0x18] sm:$0xf] %v241_v6 }
  0x1a   : > { %244 = vst [vmem:[%s211_s10 + $0x1c] sm:$0xf] %v243_v7  ;;  %v245_v8 = vld [vmem:[%s960_s9 + $0x60] sm:$0xf]  ;;  %v247_v9 = vld [vmem:[%s960_s9 + $0x6c] sm:$0xf] }
  0x1b   : > { %v249_v10 = vld [vmem:[%s960_s9 + $0x78] sm:$0xf]  ;;  %246 = vst [vmem:[%s211_s10 + $0x20] sm:$0xf] %v245_v8  ;;  %248 = vst [vmem:[%s211_s10 + $0x24] sm:$0xf] %v247_v9 }
  0x1c   : > { %250 = vst [vmem:[%s211_s10 + $0x28] sm:$0xf] %v249_v10  ;;  %v251_v11 = vld [vmem:[%s960_s9 + $0x84] sm:$0xf]  ;;  %v253_v12 = vld [vmem:[%s960_s9 + $0x90] sm:$0xf] }
  0x1d   : > { %v255_v13 = vld [vmem:[%s960_s9 + $0x9c] sm:$0xf]  ;;  %252 = vst [vmem:[%s211_s10 + $0x2c] sm:$0xf] %v251_v11  ;;  %254 = vst [vmem:[%s211_s10 + $0x30] sm:$0xf] %v253_v12 }
  0x1e   : > { %256 = vst [vmem:[%s211_s10 + $0x34] sm:$0xf] %v255_v13  ;;  %v257_v14 = vld [vmem:[%s960_s9 + $0xa8] sm:$0xf]  ;;  %v259_v15 = vld [vmem:[%s960_s9 + $0xb4] sm:$0xf] }
  0x1f   : > { %258 = vst [vmem:[%s211_s10 + $0x38] sm:$0xf] %v257_v14  ;;  %260 = vst [vmem:[%s211_s10 + $0x3c] sm:$0xf] %v259_v15 }
  0x20 PF: > { %p726_p8 = scmp.ge.s32.totalorder %s880_s22, 1  ;;  %p320_p9 = scmp.lt.s32.totalorder %s880_s22, 4 }
  0x22   : > { %p321_p10 = pnand %p726_p8, %p320_p9 }
  0x23   : > { %v749_v16 = vld [vmem:[%s1033_s0] sm:$0xff] (!%p321_p10)   ;;  %v374_v17 = vld [vmem:[%s1033_s0 + $0x8] sm:$0xf] (!%p321_p10)  ;;  %s327_s15 = sand.u32 (!%p321_p10), 1, %s864_s18   ;;  %p367_p11 = scmp.lt.s32.totalorder (!%p321_p10), %s872_s20, 2 }
  0x24   : > { %324 = sbr.rel (%p321_p10) target bundleno = 585 (0x249), region = 77  ;;  %v750_v18 = vunpack.c.l.bf16 (!%p321_p10), %v749_v16  ;;  %v377_v19 = vunpack.c.l.bf16 (!%p321_p10), %v374_v17  ;;  %v751_v20 = vunpack.c.h.bf16 (!%p321_p10), %v749_v16  ;;  %s727_s16 = sshll.u32 (!%p321_p10), %s327_s15, 6  ;;  %v728_v52 = vld [vmem:[%s1034_s1] ss:$0 sm:$0xff] (!%p321_p10) }
  0x25   : > { %s989_s17 = scalar_lea.vmem (!%p321_p10), [#allocation2], %s727_s16  ;;  %v729_v58 = vld [vmem:[%s1035_s2] ss:$0 sm:$0xff] (!%p321_p10)  ;;  %s787_s9 = smul.u32 (!%p321_p10), 12, %s327_s15 }
  0x26   : > { %378 = vadd.xlane.f32.xlu0 (!%p321_p10), %v750_v18  ;;  %382 = vadd.xlane.f32.xlu1 (!%p321_p10), %v377_v19  ;;  %v828_v21 = vld [vmem:[%s989_s17] sm:$0xff] (!%p321_p10)   ;;  %v829_v34 = vld [vmem:[%s989_s17 + $0x8] sm:$0xff] (!%p321_p10)   ;;  %v830_v35 = vld [vmem:[%s989_s17 + $0x10] sm:$0xff] (!%p321_p10)  }
  0x27   : > { %767 = vmatprep.subr.bf16.mxu0 (!%p321_p10), %v828_v21  ;;  %v831_v36 = vld [vmem:[%s989_s17 + $0x18] sm:$0xff] (!%p321_p10)   ;;  %v832_v37 = vld [vmem:[%s989_s17 + $0x20] sm:$0xff] (!%p321_p10)   ;;  %v833_v38 = vld [vmem:[%s989_s17 + $0x28] sm:$0xff] (!%p321_p10)   ;;  %s360_s10 = scalar_lea.vmem (!%p321_p10), [#allocation3], %s787_s9 }
  0x28   : > { %768 = vmatpush3.bf16.msra.mxu0 (!%p321_p10), %v828_v21  ;;  %v834_v39 = vld [vmem:[%s989_s17 + $0x30] sm:$0xff] (!%p321_p10)   ;;  %v835_v40 = vld [vmem:[%s989_s17 + $0x38] sm:$0xff] (!%p321_p10)  }
  0x29   : > { %769 = vmatprep.subr.bf16.mxu0 (!%p321_p10), %v829_v34 }
  0x2a   : > { %380 = vadd.xlane.f32.xlu0 (!%p321_p10), %v751_v20 }
  0x2b   : > { %s368_s30 = scalar_select %p367_p11, %s872_s20, 2 }
  0x2c   : > { %770 = vmatpush3.bf16.msra.mxu0 %v829_v34  ;;  %s742_s11 = sshll.u32 (%p947_p6), %s872_s20, 2 }
  0x2d   : > { %771 = vmatprep.subr.bf16.mxu0 %v830_v35  ;;  %s369_s8 = scalar_lea.vmem %s1037_s4, %s368_s30  ;;  %s580_s13 = scalar_lea.vmem (%p947_p6), %s1038_s5, %s742_s11 }
  0x2e   : > { %v730_v2 = vld [vmem:[%s369_s8] ss:$0 sm:$0xff] }
  0x30   : > { %772 = vmatpush3.bf16.msra.mxu0 %v830_v35 }
  0x31   : > { %773 = vmatprep.subr.bf16.mxu0 %v831_v36 }
  0x34   : > { %774 = vmatpush3.bf16.msra.mxu0 %v831_v36 }
  0x35   : > { %775 = vmatprep.subr.bf16.mxu0 %v832_v37 }
  0x38   : > { %776 = vmatpush3.bf16.msra.mxu0 %v832_v37 }
  0x39   : > { %777 = vmatprep.subr.bf16.mxu0 %v833_v38 }
  0x3c   : > { %778 = vmatpush3.bf16.msra.mxu0 %v833_v38 }
  0x3d   : > { %779 = vmatprep.subr.bf16.mxu0 %v834_v39 }
  0x40   : > { %780 = vmatpush3.bf16.msra.mxu0 %v834_v39 }
  0x41   : > { %781 = vmatprep.subr.bf16.mxu0 %v835_v40 }
  0x44   : > { %782 = vmatpush3.bf16.msra.mxu0 %v835_v40 }
  0xb3   : > { %v379_v22 = vpop.xlane.xlu0 %378  ;;  %v383_v23 = vpop.xlane.xlu1 %382 }
  0xb4   : > { %v385_v24 = vmul.f32 0.0078125, %v379_v22  ;;  %v387_v25 = vmul.f32 0.0078125, %v383_v23 }
  0xb6   : > { %v388_v26 = vsub.f32 %v750_v18, %v385_v24  ;;  %v390_v27 = vsub.f32 %v377_v19, %v387_v25 }
  0xb7   : > { %v381_v28 = vpop.xlane.xlu0 %380 }
  0xb8   : > { %v386_v29 = vmul.f32 0.0078125, %v381_v28  ;;  %v391_v30 = vmul.f32 %v388_v26, %v388_v26  ;;  %v393_v32 = vmul.f32 %v390_v27, %v390_v27 }
  0xba   : > { %v389_v31 = vsub.f32 %v751_v20, %v386_v29  ;;  %394 = vadd.xlane.f32.xlu1 %v391_v30 }
  0xbc   : > { %v392_v33 = vmul.f32 %v389_v31, %v389_v31 }
  0xbe   : > { %398 = vadd.xlane.f32.xlu1 %v393_v32  ;;  %396 = vadd.xlane.f32.xlu0 %v392_v33 }
 0x147   : > { %v395_v41 = vpop.xlane.xlu1 %394 }
 0x148   : > { %v400_v42 = vmul.f32 0.0078125, %v395_v41 }
 0x14a   : > { %v403_v43 = vadd.f32 1e-06, %v400_v42 }
 0x14b   : > { %v399_v44 = vpop.xlane.xlu1 %398  ;;  %v397_v45 = vpop.xlane.xlu0 %396 }
 0x14c   : > { %836 = vrsqrt.f32 %v403_v43  ;;  %v402_v46 = vmul.f32 0.0078125, %v399_v44  ;;  %v401_v47 = vmul.f32 0.0078125, %v397_v45 }
 0x14e   : > { %v405_v48 = vadd.f32 1e-06, %v402_v46  ;;  %v404_v49 = vadd.f32 1e-06, %v401_v47 }
 0x150   : > { %838 = vrsqrt.f32 %v405_v48 }
 0x151   : > { %840 = vrsqrt.f32 %v404_v49 }
 0x156   : > { %v837_v50 = vpop.eup %836 }
 0x157   : > { %v409_v51 = vmul.f32 %v837_v50, %v388_v26 }
 0x159   : > { %v419_v57 = vmul.f32 %v728_v52, %v409_v51 }
 0x15a   : > { %v839_v53 = vpop.eup %838 }
 0x15b   : > { %v841_v54 = vpop.eup %840  ;;  %v411_v55 = vmul.f32 %v839_v53, %v390_v27  ;;  %v429_v62 = vadd.f32 %v729_v58, %v419_v57 }
 0x15c   : > { %v410_v56 = vmul.f32 %v841_v54, %v389_v31 }
 0x15d   : > { %v421_v59 = vmul.f32 %v728_v52, %v411_v55 }
 0x15e   : > { %v420_v60 = vmul.f32 %v728_v52, %v410_v56 }
 0x15f   : > { %v431_v61 = vadd.f32 %v729_v58, %v421_v59 }
 0x160   : > { %v430_v63 = vadd.f32 %v729_v58, %v420_v60 }
 0x161   : > { %v433_v0 = vpack.c.bf16 %v431_v61, %v431_v61 }
 0x162   : > { %v432_v1 = vpack.c.bf16 %v430_v63, %v429_v62 }
 0x164   : > { %783 = vmatprep.mubr.bf16.mxu0 %v432_v1 }
 0x165   : > { %784 = vmatmul.mubr.bf16.vlgmr.msra.gmra.mrb[0].mxu0 %v433_v0 }
 0x238   : > { %v785_v3 = vpop.f32.mrb[0].mxu0 }
 0x239   : > { %v548_v4 = vadd.f32 %v785_v3, %v730_v2  ;;  %v539_v5 = vpop.f32.mrb[1].mxu0 }
 0x23a   : > { %v786_v6 = vpop.f32.mrb[2].mxu0  ;;  %v540_v9 = vadd.f32 %v730_v2, %v539_v5  ;;  %575 = sbr.rel (!%p947_p6) target bundleno = 585 (0x249), region = 85 }
 0x23b   : > { %v747_v7 = vpack.c.bf16 %v548_v4, %v548_v4  ;;  %v542_v8 = vpop.f32.mrb[3].mxu0 }
 0x23c   : > { %v543_v10 = vadd.f32 %v730_v2, %v542_v8 }
 0x23d   : > { %568 = vst [vmem:[%s360_s10 + $0x8] sm:$0xf] %v747_v7 }
 0x23e   : > { %v755_v11 = vpack.c.bf16 %v543_v10, %v540_v9 }
 0x240   : > { %756 = vst [vmem:[%s360_s10] sm:$0xff] %v755_v11  }
 0x244   : > { %v600_v14 = vld [vmem:[%s360_s10 + $0x8] sm:$0xf] }
 0x245   : > { %601 = vst [vmem:[%s580_s13 + $0x18] sm:$0xf] %v600_v14 }
 0x247   : > { %v596_v12 = vld [vmem:[%s360_s10] sm:$0xf]  ;;  %v598_v13 = vld [vmem:[%s360_s10 + $0x4] sm:$0xf] }
 0x248   : > { %597 = vst [vmem:[%s580_s13] sm:$0xf] %v596_v12  ;;  %599 = vst [vmem:[%s580_s13 + $0xc] sm:$0xf] %v598_v13 }
 0x249 PF: > { %s15_s22 = sadd.s32 1, %s880_s22   ;;  %s1040_s18 = smov %s868_s19 }
 0x24a   : > { %p12_p12 = scmp.ge.s32.totalorder %s15_s22, 5   ;;  %s1041_s19 = smov %s952_s28 }
 0x24b   : > { %s1042_s20 = smov %s876_s21  ;;  %s1043_s21 = smov %s1045_s23 }
 0x24c   :  { %14 = sbr.rel (!%p12_p12) target bundleno = 3 (0x3), region = 163 }

// kernel: aejepa_forward.14
= control target key start
LH: loop header
LB: loop body
LE: loop exit
PB: predicated region body
PF: predicated region fallthrough
CT: control target
= control target key end

     0   :  { %s1007_s6 = smov 0   ;;  %s1116_s0 = inlined_call_operand.vmem [shape: bf16[2,12,12,32], index: 0, kind: input, shape index: {}]   ;;  %s1117_s1 = inlined_call_operand.vmem [shape: bf16[2,4,12,32], index: 1, kind: output, shape index: {}]  }
   0x1 LB: > { %s793_s7 = sadd.s32 4294967295, %s993_s6   ;;  %p797_p0 = scmp.ge.s32.totalorder %s993_s6, 1  ;;  %s993_s6 = sphi %s1007_s6, %s11_s6  }
   0x2   : > { %p87_p1 = scmp.lt.s32.totalorder %s993_s6, 3 }
   0x4   : > { %p88_p2 = pnand %p797_p0, %p87_p1 }
   0x5   : > { %p107_p3 = scmp.lt.s32.totalorder (!%p88_p2), %s793_s7, 1  ;;  %v995_v0 = vmov (!%p88_p2), 0.0   ;;  %vm996_vm0 = vmmov (!%p88_p2), 0   ;;  %vm136_vm1 = vcmask (!%p88_p2), 261120   ;;  %vm186_vm2 = vcmask (!%p88_p2), 97280  }
   0x6   : > { %91 = sbr.rel (%p88_p2) target bundleno = 1333 (0x535), region = 24  ;;  %884 = vmatprep.subr.bf16.mxu0 (!%p88_p2), %v995_v0  ;;  %886 = vmatprep.mubr.msk.bf16.mxu0 (!%p88_p2), %vm996_vm0, %v995_v0  ;;  %vm190_vm3 = vcmask (!%p88_p2), 93184   ;;  %vm219_vm4 = vcmask (!%p88_p2), 1045504   ;;  %vm272_vm5 = vcmask (!%p88_p2), 257024   ;;  %vm274_vm6 = vcmask (!%p88_p2), 254976  }
   0x7   : > { %890 = vmatprep.subr.bf16.mxu1 (!%p88_p2), %v995_v0  ;;  %892 = vmatprep.mubr.msk.bf16.mxu1 (!%p88_p2), %vm996_vm0, %v995_v0 }
   0xd   : > { %s1119_s7 = smov (!%p107_p3, %s793_s7), 1 }
   0xe   : > { %s932_s8 = smul.u32 96, %s1119_s7  ;;  %s859_s12 = sshll.u32 %s1119_s7, 5 }
   0xf   : > { %s1068_s15 = scalar_lea.vmem %s1117_s1, %s859_s12 }
  0x10   : > { %s1027_s11 = scalar_lea.vmem %s1116_s0, %s932_s8 }
  0x11   : > { %v943_v1 = vld [vmem:[%s1027_s11 + $0x20] sm:$0x3f]   ;;  %v946_v27 = vld [vmem:[%s1027_s11 + $0x28] sm:$0x3f]   ;;  %v948_v33 = vld [vmem:[%s1027_s11 + $0x30] sm:$0x3f]  }
  0x12   : > { %v141_v2 = vsel %vm136_vm1, %v943_v1, 0  ;;  %v944_v3 = vld [vmem:[%s1027_s11] sm:$0x3f]   ;;  %v299_v32 = vsel %vm136_vm1, %v946_v27, 0  ;;  %v947_v34 = vld [vmem:[%s1027_s11 + $0x8] sm:$0x3f]  }
  0x13   : > { %885 = vmatpush3.bf16.xpose.msra.mxu0 %v141_v2  ;;  %v945_v22 = vld [vmem:[%s1027_s11 + $0x40] sm:$0x3f]   ;;  %v453_v35 = vsel %vm136_vm1, %v948_v33, 0  ;;  %v950_v36 = vld [vmem:[%s1027_s11 + $0x38] sm:$0x3f]  }
  0x14   : > { %902 = vmatprep.subr.bf16.mxu0 %v995_v0  ;;  %v221_v23 = vsel %vm219_vm4, %v945_v22, 0  ;;  %v949_v37 = vld [vmem:[%s1027_s11 + $0x10] sm:$0x3f]   ;;  %v607_v38 = vsel %vm136_vm1, %v950_v36, 0  ;;  %v951_v39 = vld [vmem:[%s1027_s11 + $0x18] sm:$0x3f]  }
  0x15   : > { %891 = vmatpush3.bf16.msra.mxu1 %v221_v23 }
  0x16   : > { %896 = vmatprep.subr.bf16.mxu1 %v995_v0 }
  0x1a   : > { %887 = vmatmul.mubr.msk.bf16.vlgmr.msra.gmra.mrb[0].mxu0 %vm136_vm1, %v944_v3 }
  0x1b   : > { %904 = vmatprep.mubr.msk.bf16.mxu0 %vm996_vm0, %v995_v0 }
  0xed   : > { %v177_v4 = vpop.f32.mrb[0].mxu0 }
  0xee   : > { %v184_v5 = vmul.f32 0.17677669, %v177_v4  ;;  %v888_v6 = vpop.f32.mrb[1].mxu0 }
  0xef   : > { %v180_v7 = vpop.f32.mrb[2].mxu0 }
  0xf0   : > { %v185_v8 = vmul.f32 0.17677669, %v180_v7  ;;  %v889_v9 = vpop.f32.mrb[3].mxu0  ;;  %v187_v10 = vsel %vm186_vm2, %v184_v5, -inf }
  0xf1   : > { %188 = vmax.xlane.f32.xlu0 %v187_v10 }
  0xf2   : > { %v191_v11 = vsel %vm190_vm3, %v185_v8, -inf }
  0xf5   : > { %192 = vmax.xlane.f32.xlu0 %v191_v11 }
 0x17e   : > { %v189_v12 = vpop.xlane.xlu0 %188 }
 0x17f   : > { %v194_v13 = vsub.f32 %v184_v5, %v189_v12 }
 0x181   : > { %v196_v14 = vmul.f32 1.442695, %v194_v13 }
 0x182   : > { %v193_v15 = vpop.xlane.xlu0 %192 }
 0x183   : > { %955 = vpow2.f32 %v196_v14  ;;  %v195_v16 = vsub.f32 %v185_v8, %v193_v15 }
 0x185   : > { %v198_v17 = vmul.f32 1.442695, %v195_v16 }
 0x187   : > { %957 = vpow2.f32 %v198_v17 }
 0x18d   : > { %v956_v18 = vpop.eup %955 }
 0x18e   : > { %v200_v19 = vsel %vm186_vm2, %v956_v18, 0.0 }
 0x18f   : > { %201 = vadd.xlane.f32.xlu1 %v200_v19 }
 0x191   : > { %v958_v20 = vpop.eup %957 }
 0x192   : > { %v203_v21 = vsel %vm190_vm3, %v958_v20, 0.0 }
 0x193   : > { %204 = vadd.xlane.f32.xlu1 %v203_v21 }
 0x21c   : > { %v202_v24 = vpop.xlane.xlu1 %201 }
 0x21d   : > { %959 = vrcp.f32 %v202_v24 }
 0x220   : > { %v205_v25 = vpop.xlane.xlu1 %204 }
 0x221   : > { %961 = vrcp.f32 %v205_v25 }
 0x227   : > { %v960_v26 = vpop.eup %959 }
 0x228   : > { %v208_v29 = vmul.f32 %v960_v26, %v956_v18 }
 0x22b   : > { %v962_v28 = vpop.eup %961 }
 0x22c   : > { %v209_v30 = vmul.f32 %v962_v28, %v958_v20 }
 0x22e   : > { %v210_v31 = vpack.c.bf16 %v209_v30, %v208_v29 }
 0x230   : > { %893 = vmatmul.mubr.msk.bf16.vlgmr.msra.gmra.mrb[0].mxu1 %vm186_vm2, %v210_v31 }
 0x231   : > { %897 = vmatpush3.bf16.xpose.msra.mxu1 %v299_v32  ;;  %898 = vmatprep.mubr.msk.bf16.mxu1 %vm996_vm0, %v995_v0 }
 0x232   : > { %908 = vmatprep.subr.bf16.mxu1 %v995_v0 }
 0x238   : > { %899 = vmatmul.mubr.msk.bf16.vlgmr.msra.gmra.mrb[4].mxu1 %vm136_vm1, %v947_v34 }
 0x239   : > { %909 = vmatpush3.bf16.xpose.msra.mxu1 %v453_v35  ;;  %910 = vmatprep.mubr.msk.bf16.mxu1 %vm996_vm0, %v995_v0 }
 0x23a   : > { %920 = vmatprep.subr.bf16.mxu1 %v995_v0 }
 0x240   : > { %911 = vmatmul.mubr.msk.bf16.vlgmr.msra.gmra.mrb[8].mxu1 %vm136_vm1, %v949_v37  ;;  %v952_v37 = vld [vmem:[%s1027_s11 + $0x48] sm:$0x3f]  }
 0x241   : > { %921 = vmatpush3.bf16.xpose.msra.mxu1 %v607_v38  ;;  %922 = vmatprep.mubr.msk.bf16.mxu1 %vm996_vm0, %v995_v0  ;;  %v376_v38 = vsel %vm219_vm4, %v952_v37, 0 }
 0x242   : > { %903 = vmatpush3.bf16.msra.mxu0 %v376_v38 }
 0x243   : > { %914 = vmatprep.subr.bf16.mxu0 %v995_v0 }
 0x248   : > { %923 = vmatmul.mubr.msk.bf16.vlgmr.msra.gmra.mrb[12].mxu1 %vm136_vm1, %v951_v39 }
 0x303   : > { %v257_v40 = vpop.f32.mrb[0].mxu1 }
 0x304   : > { %v860_v41 = vpack.c.bf16 %v257_v40, %v257_v40  ;;  %v894_v42 = vpop.f32.mrb[1].mxu1 }
 0x305   : > { %v260_v43 = vpop.f32.mrb[2].mxu1 }
 0x306   : > { %273 = vst.msk [vmem:[%s1068_s15] sm:$0xf] %vm272_vm5, %v860_v41  ;;  %v861_v44 = vpack.c.bf16 %v260_v43, %v260_v43  ;;  %v895_v45 = vpop.f32.mrb[3].mxu1 }
 0x308   : > { %275 = vst.msk [vmem:[%s1068_s15 + $0x4] sm:$0x3] %vm274_vm6, %v861_v44  ;;  %v953_v44 = vld [vmem:[%s1027_s11 + $0x50] sm:$0x3f]  }
 0x30b   : > { %v335_v46 = vpop.f32.mrb[4].mxu1 }
 0x30c   : > { %v342_v47 = vmul.f32 0.17677669, %v335_v46  ;;  %v900_v48 = vpop.f32.mrb[5].mxu1 }
 0x30d   : > { %v338_v49 = vpop.f32.mrb[6].mxu1 }
 0x30e   : > { %v343_v50 = vmul.f32 0.17677669, %v338_v49  ;;  %v901_v51 = vpop.f32.mrb[7].mxu1  ;;  %v344_v52 = vsel %vm186_vm2, %v342_v47, -inf }
 0x30f   : > { %345 = vmax.xlane.f32.xlu0 %v344_v52 }
 0x310   : > { %v347_v53 = vsel %vm190_vm3, %v343_v50, -inf }
 0x311   : > { %348 = vmax.xlane.f32.xlu1 %v347_v53  ;;  %v954_v53 = vld [vmem:[%s1027_s11 + $0x58] sm:$0x3f]  }
 0x313   : > { %v489_v54 = vpop.f32.mrb[8].mxu1 }
 0x314   : > { %v496_v55 = vmul.f32 0.17677669, %v489_v54  ;;  %v912_v56 = vpop.f32.mrb[9].mxu1 }
 0x315   : > { %v492_v57 = vpop.f32.mrb[10].mxu1 }
 0x316   : > { %v497_v58 = vmul.f32 0.17677669, %v492_v57  ;;  %v913_v59 = vpop.f32.mrb[11].mxu1  ;;  %v498_v60 = vsel %vm186_vm2, %v496_v55, -inf }
 0x317   : > { %499 = vmax.xlane.f32.xlu0 %v498_v60 }
 0x318   : > { %v501_v61 = vsel %vm190_vm3, %v497_v58, -inf }
 0x319   : > { %502 = vmax.xlane.f32.xlu1 %v501_v61 }
 0x31b   : > { %v643_v62 = vpop.f32.mrb[12].mxu1 }
 0x31c   : > { %v650_v63 = vmul.f32 0.17677669, %v643_v62  ;;  %v924_v1 = vpop.f32.mrb[13].mxu1 }
 0x31d   : > { %v646_v2 = vpop.f32.mrb[14].mxu1 }
 0x31e   : > { %v651_v3 = vmul.f32 0.17677669, %v646_v2  ;;  %v925_v4 = vpop.f32.mrb[15].mxu1  ;;  %v652_v5 = vsel %vm186_vm2, %v650_v63, -inf }
 0x31f   : > { %653 = vmax.xlane.f32.xlu0 %v652_v5 }
 0x320   : > { %v655_v6 = vsel %vm190_vm3, %v651_v3, -inf }
 0x321   : > { %656 = vmax.xlane.f32.xlu1 %v655_v6 }
 0x39c   : > { %v346_v7 = vpop.xlane.xlu0 %345 }
 0x39d   : > { %v350_v8 = vsub.f32 %v342_v47, %v346_v7 }
 0x39e   : > { %v349_v9 = vpop.xlane.xlu1 %348 }
 0x39f   : > { %v352_v10 = vmul.f32 1.442695, %v350_v8  ;;  %v351_v11 = vsub.f32 %v343_v50, %v349_v9  ;;  %v530_v50 = vsel %vm219_vm4, %v953_v44, 0 }
 0x3a1   : > { %963 = vpow2.f32 %v352_v10  ;;  %v354_v12 = vmul.f32 1.442695, %v351_v11 }
 0x3a3   : > { %965 = vpow2.f32 %v354_v12 }
 0x3a4   : > { %v500_v13 = vpop.xlane.xlu0 %499 }
 0x3a5   : > { %v504_v14 = vsub.f32 %v496_v55, %v500_v13 }
 0x3a6   : > { %v503_v15 = vpop.xlane.xlu1 %502 }
 0x3a7   : > { %v506_v16 = vmul.f32 1.442695, %v504_v14  ;;  %v505_v17 = vsub.f32 %v497_v58, %v503_v15  ;;  %v684_v58 = vsel %vm219_vm4, %v954_v53, 0 }
 0x3a9   : > { %967 = vpow2.f32 %v506_v16  ;;  %v508_v18 = vmul.f32 1.442695, %v505_v17 }
 0x3ab   : > { %v964_v19 = vpop.eup %963  ;;  %969 = vpow2.f32 %v508_v18 }
 0x3ac   : > { %v654_v20 = vpop.xlane.xlu0 %653  ;;  %v356_v21 = vsel %vm186_vm2, %v964_v19, 0.0 }
 0x3ad   : > { %v966_v22 = vpop.eup %965  ;;  %v658_v23 = vsub.f32 %v650_v63, %v654_v20  ;;  %357 = vadd.xlane.f32.xlu0 %v356_v21 }
 0x3ae   : > { %v657_v24 = vpop.xlane.xlu1 %656  ;;  %v359_v25 = vsel %vm190_vm3, %v966_v22, 0.0 }
 0x3af   : > { %v660_v26 = vmul.f32 1.442695, %v658_v23  ;;  %v659_v27 = vsub.f32 %v651_v3, %v657_v24  ;;  %360 = vadd.xlane.f32.xlu1 %v359_v25 }
 0x3b1   : > { %971 = vpow2.f32 %v660_v26  ;;  %v662_v28 = vmul.f32 1.442695, %v659_v27 }
 0x3b3   : > { %v968_v29 = vpop.eup %967  ;;  %973 = vpow2.f32 %v662_v28 }
 0x3b4   : > { %v510_v30 = vsel %vm186_vm2, %v968_v29, 0.0 }
 0x3b5   : > { %v970_v31 = vpop.eup %969  ;;  %511 = vadd.xlane.f32.xlu0 %v510_v30 }
 0x3b6   : > { %v513_v32 = vsel %vm190_vm3, %v970_v31, 0.0 }
 0x3b7   : > { %514 = vadd.xlane.f32.xlu1 %v513_v32 }
 0x3bb   : > { %v972_v33 = vpop.eup %971 }
 0x3bc   : > { %v664_v34 = vsel %vm186_vm2, %v972_v33, 0.0 }
 0x3bd   : > { %v974_v35 = vpop.eup %973  ;;  %665 = vadd.xlane.f32.xlu0 %v664_v34 }
 0x3be   : > { %v667_v36 = vsel %vm190_vm3, %v974_v35, 0.0 }
 0x3bf   : > { %668 = vadd.xlane.f32.xlu1 %v667_v36 }
 0x43a   : > { %v358_v39 = vpop.xlane.xlu0 %357 }
 0x43b   : > { %975 = vrcp.f32 %v358_v39 }
 0x43c   : > { %v361_v40 = vpop.xlane.xlu1 %360 }
 0x43d   : > { %977 = vrcp.f32 %v361_v40 }
 0x442   : > { %v512_v41 = vpop.xlane.xlu0 %511 }
 0x443   : > { %979 = vrcp.f32 %v512_v41 }
 0x444   : > { %v515_v42 = vpop.xlane.xlu1 %514 }
 0x445   : > { %v976_v43 = vpop.eup %975  ;;  %981 = vrcp.f32 %v515_v42 }
 0x446   : > { %v364_v46 = vmul.f32 %v976_v43, %v964_v19 }
 0x447   : > { %v978_v45 = vpop.eup %977 }
 0x448   : > { %v365_v47 = vmul.f32 %v978_v45, %v966_v22 }
 0x44a   : > { %v666_v48 = vpop.xlane.xlu0 %665  ;;  %v366_v49 = vpack.c.bf16 %v365_v47, %v364_v46 }
 0x44b   : > { %983 = vrcp.f32 %v666_v48 }
 0x44c   : > { %905 = vmatmul.mubr.msk.bf16.vlgmr.msra.gmra.mrb[4].mxu0 %vm186_vm2, %v366_v49  ;;  %v669_v51 = vpop.xlane.xlu1 %668 }
 0x44d   : > { %v980_v52 = vpop.eup %979  ;;  %915 = vmatpush3.bf16.msra.mxu0 %v530_v50  ;;  %985 = vrcp.f32 %v669_v51  ;;  %916 = vmatprep.mubr.msk.bf16.mxu0 %vm996_vm0, %v995_v0 }
 0x44e   : > { %926 = vmatprep.subr.bf16.mxu0 %v995_v0  ;;  %v518_v55 = vmul.f32 %v980_v52, %v968_v29 }
 0x44f   : > { %v982_v54 = vpop.eup %981 }
 0x450   : > { %v519_v56 = vmul.f32 %v982_v54, %v970_v31 }
 0x452   : > { %v520_v57 = vpack.c.bf16 %v519_v56, %v518_v55 }
 0x454   : > { %917 = vmatmul.mubr.msk.bf16.vlgmr.msra.gmra.mrb[8].mxu0 %vm186_vm2, %v520_v57 }
 0x455   : > { %v984_v59 = vpop.eup %983  ;;  %927 = vmatpush3.bf16.msra.mxu0 %v684_v58  ;;  %928 = vmatprep.mubr.msk.bf16.mxu0 %vm996_vm0, %v995_v0 }
 0x456   : > { %v672_v61 = vmul.f32 %v984_v59, %v972_v33 }
 0x457   : > { %v986_v60 = vpop.eup %985 }
 0x458   : > { %v673_v62 = vmul.f32 %v986_v60, %v974_v35 }
 0x45a   : > { %v674_v63 = vpack.c.bf16 %v673_v62, %v672_v61 }
 0x45c   : > { %929 = vmatmul.mubr.msk.bf16.vlgmr.msra.gmra.mrb[12].mxu0 %vm186_vm2, %v674_v63 }
 0x51f   : > { %v412_v1 = vpop.f32.mrb[4].mxu0 }
 0x520   : > { %v862_v2 = vpack.c.bf16 %v412_v1, %v412_v1  ;;  %v906_v3 = vpop.f32.mrb[5].mxu0 }
 0x521   : > { %v415_v4 = vpop.f32.mrb[6].mxu0 }
 0x522   : > { %825 = vst.msk [vmem:[%s1068_s15 + $0x8] sm:$0xf] %vm272_vm5, %v862_v2  ;;  %v863_v5 = vpack.c.bf16 %v415_v4, %v415_v4  ;;  %v907_v6 = vpop.f32.mrb[7].mxu0 }
 0x524   : > { %826 = vst.msk [vmem:[%s1068_s15 + $0xc] sm:$0x3] %vm274_vm6, %v863_v5 }
 0x527   : > { %v566_v0 = vpop.f32.mrb[8].mxu0 }
 0x528   : > { %v864_v7 = vpack.c.bf16 %v566_v0, %v566_v0  ;;  %v918_v8 = vpop.f32.mrb[9].mxu0 }
 0x529   : > { %v569_v9 = vpop.f32.mrb[10].mxu0 }
 0x52a   : > { %840 = vst.msk [vmem:[%s1068_s15 + $0x10] sm:$0xf] %vm272_vm5, %v864_v7  ;;  %v865_v10 = vpack.c.bf16 %v569_v9, %v569_v9  ;;  %v919_v11 = vpop.f32.mrb[11].mxu0 }
 0x52c   : > { %841 = vst.msk [vmem:[%s1068_s15 + $0x14] sm:$0x3] %vm274_vm6, %v865_v10 }
 0x52f   : > { %v720_v12 = vpop.f32.mrb[12].mxu0 }
 0x530   : > { %v866_v13 = vpack.c.bf16 %v720_v12, %v720_v12  ;;  %v930_v14 = vpop.f32.mrb[13].mxu0 }
 0x531   : > { %v723_v15 = vpop.f32.mrb[14].mxu0 }
 0x532   : > { %855 = vst.msk [vmem:[%s1068_s15 + $0x18] sm:$0xf] %vm272_vm5, %v866_v13  ;;  %v867_v16 = vpack.c.bf16 %v723_v15, %v723_v15  ;;  %v931_v17 = vpop.f32.mrb[15].mxu0 }
 0x534   : > { %856 = vst.msk [vmem:[%s1068_s15 + $0x1c] sm:$0x3] %vm274_vm6, %v867_v16 }
 0x535 PF: > { %s11_s6 = sadd.s32 1, %s993_s6  }
 0x536   : > { %p8_p4 = scmp.ge.s32.totalorder %s11_s6, 4  }
 0x538   :  { %10 = sbr.rel (!%p8_p4) target bundleno = 1 (0x1), region = 68 }

// kernel: aejepa_forward.15
= control target key start
LH: loop header
LB: loop body
LE: loop exit
PB: predicated region body
PF: predicated region fallthrough
CT: control target
= control target key end

     0   :  { %s340_s1 = inlined_call_operand.vmem [shape: bf16[128,128], index: 1, kind: input, shape index: {}]   ;;  %s341_s0 = inlined_call_operand.vmem [shape: bf16[24,128], index: 0, kind: input, shape index: {}]   ;;  %s342_s3 = inlined_call_operand.vmem [shape: bf16[24,128], index: 3, kind: input, shape index: {}]   ;;  %s343_s2 = inlined_call_operand.vmem [shape: f32[1,128], index: 2, kind: input, shape index: {}]   ;;  %s344_s4 = inlined_call_operand.vmem [shape: bf16[24,128], index: 4, kind: output, shape index: {}]  }
   0x1   :  { %v260_v0 = vld [vmem:[%s340_s1] sm:$0xff]   ;;  %v261_v1 = vld [vmem:[%s340_s1 + $0x8] sm:$0xff]   ;;  %v262_v2 = vld [vmem:[%s340_s1 + $0x10] sm:$0xff]  }
   0x2   :  { %240 = vmatprep.subr.bf16.mxu0 %v260_v0  ;;  %v263_v3 = vld [vmem:[%s340_s1 + $0x18] sm:$0xff]   ;;  %v268_v4 = vld [vmem:[%s341_s0] sm:$0xff]   ;;  %v265_v6 = vld [vmem:[%s340_s1 + $0x28] sm:$0xff]  }
   0x3   :  { %241 = vmatpush3.bf16.msra.mxu0 %v260_v0  ;;  %256 = vmatprep.mubr.bf16.mxu0 %v268_v4  ;;  %v264_v5 = vld [vmem:[%s340_s1 + $0x20] sm:$0xff]   ;;  %v266_v7 = vld [vmem:[%s340_s1 + $0x30] sm:$0xff]   ;;  %v267_v8 = vld [vmem:[%s340_s1 + $0x38] sm:$0xff]  }
   0x4   :  { %242 = vmatprep.subr.bf16.mxu0 %v261_v1  ;;  %v269_v9 = vld [vmem:[%s341_s0 + $0x8] ss:$0 sps:$4 sm:$0xff]   ;;  %v214_v11 = vld [vmem:[%s343_s2] ss:$0 sm:$0xff] }
   0x5   :  { %v177_v10 = vld [vmem:[%s342_s3 + $0x8] sm:$0xf]  ;;  %v222_v13 = vld [vmem:[%s342_s3] sm:$0xff]  }
   0x6   :  { %v180_v12 = vunpack.c.l.bf16 %v177_v10  ;;  %v223_v18 = vunpack.c.l.bf16 %v222_v13  ;;  %v224_v20 = vunpack.c.h.bf16 %v222_v13 }
   0x7   :  { %243 = vmatpush3.bf16.msra.mxu0 %v261_v1 }
   0x8   :  { %244 = vmatprep.subr.bf16.mxu0 %v262_v2 }
   0xb   :  { %245 = vmatpush3.bf16.msra.mxu0 %v262_v2 }
   0xc   :  { %246 = vmatprep.subr.bf16.mxu0 %v263_v3 }
   0xf   :  { %247 = vmatpush3.bf16.msra.mxu0 %v263_v3 }
  0x10   :  { %248 = vmatprep.subr.bf16.mxu0 %v264_v5 }
  0x13   :  { %249 = vmatpush3.bf16.msra.mxu0 %v264_v5 }
  0x14   :  { %250 = vmatprep.subr.bf16.mxu0 %v265_v6 }
  0x17   :  { %251 = vmatpush3.bf16.msra.mxu0 %v265_v6 }
  0x18   :  { %252 = vmatprep.subr.bf16.mxu0 %v266_v7 }
  0x1b   :  { %253 = vmatpush3.bf16.msra.mxu0 %v266_v7 }
  0x1c   :  { %254 = vmatprep.subr.bf16.mxu0 %v267_v8 }
  0x1f   :  { %255 = vmatpush3.bf16.msra.mxu0 %v267_v8 }
  0x22   :  { %257 = vmatmul.mubr.bf16.vlgmr.msra.gmra.mrb[0].mxu0 %v269_v9 }
  0xf5   :  { %v258_v14 = vpop.f32.mrb[0].mxu0 }
  0xf6   :  { %v174_v15 = vadd.f32 %v258_v14, %v214_v11  ;;  %v139_v16 = vpop.f32.mrb[1].mxu0 }
  0xf7   :  { %v172_v17 = vadd.f32 %v214_v11, %v139_v16  ;;  %v259_v19 = vpop.f32.mrb[2].mxu0 }
  0xf8   :  { %v183_v21 = vadd.f32 %v180_v12, %v174_v15  ;;  %v142_v22 = vpop.f32.mrb[3].mxu0 }
  0xf9   :  { %v173_v23 = vadd.f32 %v214_v11, %v142_v22  ;;  %v181_v25 = vadd.f32 %v223_v18, %v172_v17 }
  0xfa   :  { %v220_v24 = vpack.c.bf16 %v183_v21, %v183_v21 }
  0xfb   :  { %v182_v26 = vadd.f32 %v224_v20, %v173_v23 }
  0xfc   :  { %199 = vst [vmem:[%s344_s4 + $0x8] sm:$0xf] %v220_v24 }
  0xfd   :  { %v228_v27 = vpack.c.bf16 %v182_v26, %v181_v25 }
  0xff   :  { %229 = vst [vmem:[%s344_s4] sm:$0xff] %v228_v27  }

// kernel: aejepa_forward.23
= control target key start
LH: loop header
LB: loop body
LE: loop exit
PB: predicated region body
PF: predicated region fallthrough
CT: control target
= control target key end

     0   :  { %s800_s12 = smov 0   ;;  %s802_s13 = smov 0   ;;  %s889_s0 = inlined_call_operand.vmem [shape: bf16[8,128], index: 0, kind: input, shape index: {}]   ;;  %s890_s1 = inlined_call_operand.vmem [shape: bf16[128,768], index: 1, kind: input, shape index: {}]   ;;  %s891_s2 = inlined_call_operand.vmem [shape: f32[1,768], index: 2, kind: input, shape index: {}]   ;;  %s892_s3 = inlined_call_operand.vmem [shape: f32[8,768], index: 3, kind: output, shape index: {}]  }
   0x1   :  { %s804_s14 = smov 0   ;;  %s806_s15 = smov 0  }
   0x2   :  { %s808_s16 = smov 0  }
   0x3 LB: > { %s28_s17 = sadd.s32 1, %s773_s15  ;;  %p76_p1 = scmp.ne.s32.totalorder %s765_s13, %s761_s12  ;;  %s777_s16 = sphi %s808_s16, %s13_s16   ;;  %s773_s15 = sphi %s806_s15, %s896_s15   ;;  %s769_s14 = sphi %s804_s14, %s895_s14   ;;  %s765_s13 = sphi %s802_s13, %s894_s13   ;;  %s761_s12 = sphi %s800_s12, %s893_s12  }
   0x4   : > { %p30_p0 = scmp.ge.s32.totalorder %s28_s17, 3  ;;  %p77_p2 = scmp.eq.s32.totalorder %s777_s16, 0 }
   0x5   : > { %s69_s19 = sadd.s32 1, %s765_s13  ;;  %p646_p5 = scmp.ge.s32.totalorder %s777_s16, 3 }
   0x6   : > { %s898_s17 = smov (%p30_p0, %s28_s17), 0  ;;  %p78_p3 = por %p77_p2, %p76_p1 }
   0x7   : > { %s65_s18 = ssub.s32 %s773_s15, %s898_s17  ;;  %166 = sbr.rel (%p646_p5) target bundleno = 26 (0x1a), region = 20 }
   0x8   : > { %p67_p4 = scmp.eq.s32.totalorder %s65_s18, 0 }
   0xa   : > { %s835_s20 = scalar_select %p67_p4, %s765_s13, %s69_s19  }
   0xe   : > { %169 = sbr.rel (!%p78_p3) target bundleno = 26 (0x1a), region = 24  ;;  %s171_s21 = sand.u32 (%p78_p3), 1, %s765_s13  }
   0xf   : > { %s673_s22 = sshll.u32 (%p78_p3), %s773_s15, 3  ;;  %s647_s23 = sshll.u32 (%p78_p3), %s171_s21, 7 }
  0x10   : > { %s843_s26 = scalar_lea.vmem (%p78_p3), %s890_s1, %s673_s22  ;;  %s173_s27 = scalar_lea.vmem (%p78_p3), [#allocation3], %s647_s23 }
  0x11   : > { %v237_v0 = vld [vmem:[%s843_s26] sm:$0xff] (%p78_p3)  ;;  %v239_v1 = vld [vmem:[%s843_s26 + $0x18] sm:$0xff] (%p78_p3)  ;;  %v241_v2 = vld [vmem:[%s843_s26 + $0x30] sm:$0xff] (%p78_p3) }
  0x12   : > { %238 = vst [vmem:[%s173_s27] sm:$0xff] (%p78_p3), %v237_v0  ;;  %240 = vst [vmem:[%s173_s27 + $0x8] sm:$0xff] (%p78_p3), %v239_v1  ;;  %v243_v3 = vld [vmem:[%s843_s26 + $0x48] sm:$0xff] (%p78_p3)  ;;  %v245_v4 = vld [vmem:[%s843_s26 + $0x60] sm:$0xff] (%p78_p3) }
  0x13   : > { %242 = vst [vmem:[%s173_s27 + $0x10] sm:$0xff] (%p78_p3), %v241_v2  ;;  %v247_v5 = vld [vmem:[%s843_s26 + $0x78] sm:$0xff] (%p78_p3)  ;;  %244 = vst [vmem:[%s173_s27 + $0x18] sm:$0xff] (%p78_p3), %v243_v3  ;;  %v249_v6 = vld [vmem:[%s843_s26 + $0x90] sm:$0xff] (%p78_p3) }
  0x14   : > { %246 = vst [vmem:[%s173_s27 + $0x20] sm:$0xff] (%p78_p3), %v245_v4  ;;  %248 = vst [vmem:[%s173_s27 + $0x28] sm:$0xff] (%p78_p3), %v247_v5  ;;  %v251_v7 = vld [vmem:[%s843_s26 + $0xa8] sm:$0xff] (%p78_p3)  ;;  %v253_v8 = vld [vmem:[%s843_s26 + $0xc0] sm:$0xff] (%p78_p3) }
  0x15   : > { %250 = vst [vmem:[%s173_s27 + $0x30] sm:$0xff] %v249_v6  ;;  %252 = vst [vmem:[%s173_s27 + $0x38] sm:$0xff] %v251_v7  ;;  %v255_v9 = vld [vmem:[%s843_s26 + $0xd8] sm:$0xff]  ;;  %v257_v10 = vld [vmem:[%s843_s26 + $0xf0] sm:$0xff] }
  0x16   : > { %254 = vst [vmem:[%s173_s27 + $0x40] sm:$0xff] %v253_v8  ;;  %v259_v11 = vld [vmem:[%s843_s26 + $0x108] sm:$0xff]  ;;  %256 = vst [vmem:[%s173_s27 + $0x48] sm:$0xff] %v255_v9  ;;  %v261_v12 = vld [vmem:[%s843_s26 + $0x120] sm:$0xff] }
  0x17   : > { %258 = vst [vmem:[%s173_s27 + $0x50] sm:$0xff] %v257_v10  ;;  %260 = vst [vmem:[%s173_s27 + $0x58] sm:$0xff] %v259_v11  ;;  %v263_v13 = vld [vmem:[%s843_s26 + $0x138] sm:$0xff]  ;;  %v265_v14 = vld [vmem:[%s843_s26 + $0x150] sm:$0xff] }
  0x18   : > { %262 = vst [vmem:[%s173_s27 + $0x60] sm:$0xff] %v261_v12  ;;  %264 = vst [vmem:[%s173_s27 + $0x68] sm:$0xff] %v263_v13  ;;  %v267_v15 = vld [vmem:[%s843_s26 + $0x168] sm:$0xff] }
  0x19   : > { %266 = vst [vmem:[%s173_s27 + $0x70] sm:$0xff] %v265_v14  ;;  %268 = vst [vmem:[%s173_s27 + $0x78] sm:$0xff] %v267_v15 }
  0x1a PF: > { %p650_p6 = scmp.ge.s32.totalorder %s777_s16, 1  ;;  %p281_p7 = scmp.lt.s32.totalorder %s777_s16, 4 }
  0x1c   : > { %p282_p8 = pnand %p650_p6, %p281_p7 }
  0x1d   : > { %s288_s28 = sand.u32 (!%p282_p8), 1, %s761_s12   ;;  %v779_v16 = vmov (!%p282_p8), 0   ;;  %v359_v33 = vld [vmem:[%s889_s0] sm:$0xf] (!%p282_p8)  ;;  %s652_s6 = sshll.u32 (!%p282_p8), %s769_s14, 1  ;;  %v508_v34 = vlaneseq (!%p282_p8) }
  0x1e   : > { %285 = sbr.rel (%p282_p8) target bundleno = 281 (0x119), region = 66  ;;  %s651_s29 = sshll.u32 (!%p282_p8), %s288_s28, 7  ;;  %488 = vmatprep.mubr.bf16.mxu0 (!%p282_p8), %v779_v16 }
  0x1f   : > { %s290_s30 = scalar_lea.vmem (!%p282_p8), [#allocation3], %s651_s29  ;;  %p336_p9 = scmp.lt.s32.totalorder (!%p282_p8), %s652_s6, 5  ;;  %v509_v35 = vshrl.u32 (!%p282_p8), %v508_v34, 7 }
  0x20   : > { %v715_v17 = vld [vmem:[%s290_s30 + $0x4] ss:$8 sps:$4 sm:$0xff] (!%p282_p8)   ;;  %v717_v18 = vld [vmem:[%s290_s30] ss:$8 sps:$4 sm:$0xff] (!%p282_p8)   ;;  %v718_v19 = vld [vmem:[%s290_s30 + $0x14] ss:$8 sps:$4 sm:$0xff] (!%p282_p8)  }
  0x21   : > { %456 = vmatprep.subr.bf16.mxu0 (!%p282_p8), %v715_v17  ;;  %v720_v20 = vld [vmem:[%s290_s30 + $0x10] ss:$8 sps:$4 sm:$0xff] (!%p282_p8)   ;;  %v721_v21 = vld [vmem:[%s290_s30 + $0x24] ss:$8 sps:$4 sm:$0xff] (!%p282_p8)   ;;  %v723_v22 = vld [vmem:[%s290_s30 + $0x20] ss:$8 sps:$4 sm:$0xff] (!%p282_p8)  }
  0x22   : > { %457 = vmatpush1.bf16.msra.mxu0 (!%p282_p8), %v717_v18  ;;  %v724_v23 = vld [vmem:[%s290_s30 + $0x34] ss:$8 sps:$4 sm:$0xff] (!%p282_p8)   ;;  %v726_v24 = vld [vmem:[%s290_s30 + $0x30] ss:$8 sps:$4 sm:$0xff] (!%p282_p8)   ;;  %v727_v25 = vld [vmem:[%s290_s30 + $0x44] ss:$8 sps:$4 sm:$0xff] (!%p282_p8)  }
  0x23   : > { %458 = vmatprep.subr.bf16.mxu0 (!%p282_p8), %v718_v19  ;;  %v729_v26 = vld [vmem:[%s290_s30 + $0x40] ss:$8 sps:$4 sm:$0xff] (!%p282_p8)   ;;  %v730_v27 = vld [vmem:[%s290_s30 + $0x54] ss:$8 sps:$4 sm:$0xff] (!%p282_p8)   ;;  %v732_v28 = vld [vmem:[%s290_s30 + $0x50] ss:$8 sps:$4 sm:$0xff] (!%p282_p8)  }
  0x24   : > { %v733_v29 = vld [vmem:[%s290_s30 + $0x64] ss:$8 sps:$4 sm:$0xff] (!%p282_p8)   ;;  %v735_v30 = vld [vmem:[%s290_s30 + $0x60] ss:$8 sps:$4 sm:$0xff] (!%p282_p8)   ;;  %v736_v31 = vld [vmem:[%s290_s30 + $0x74] ss:$8 sps:$4 sm:$0xff] (!%p282_p8)  }
  0x25   : > { %v738_v32 = vld [vmem:[%s290_s30 + $0x70] ss:$8 sps:$4 sm:$0xff]   ;;  %s900_s6 = smov (!%p336_p9, %s652_s6), 5  ;;  %v510_v36 = vsub.s32 0, %v509_v35  ;;  %v514_v38 = vsub.s32 1, %v509_v35 }
  0x26   : > { %459 = vmatpush1.bf16.msra.mxu0 %v720_v20  ;;  %s338_s9 = scalar_lea.vmem %s891_s2, %s900_s6  ;;  %s654_s10 = sshll.u32 %s900_s6, 3 }
  0x27   : > { %460 = vmatprep.subr.bf16.mxu0 %v721_v21  ;;  %v506_v37 = vld [vmem:[%s338_s9] sm:$0x3]  ;;  %s348_s18 = scalar_lea.vmem %s892_s3, %s654_s10 }
  0x28   : > { %v511_v39 = vrot.slane %v506_v37, %v510_v36  ;;  %v515_v40 = vrot.slane %v506_v37, %v514_v38 }
  0x2a   : > { %461 = vmatpush1.bf16.msra.mxu0 %v723_v22 }
  0x2b   : > { %462 = vmatprep.subr.bf16.mxu0 %v724_v23 }
  0x2e   : > { %463 = vmatpush1.bf16.msra.mxu0 %v726_v24 }
  0x2f   : > { %464 = vmatprep.subr.bf16.mxu0 %v727_v25 }
  0x32   : > { %465 = vmatpush1.bf16.msra.mxu0 %v729_v26 }
  0x33   : > { %466 = vmatprep.subr.bf16.mxu0 %v730_v27 }
  0x36   : > { %467 = vmatpush1.bf16.msra.mxu0 %v732_v28 }
  0x37   : > { %468 = vmatprep.subr.bf16.mxu0 %v733_v29 }
  0x3a   : > { %469 = vmatpush1.bf16.msra.mxu0 %v735_v30 }
  0x3b   : > { %470 = vmatprep.subr.bf16.mxu0 %v736_v31 }
  0x3e   : > { %471 = vmatpush1.bf16.msra.mxu0 %v738_v32 }
  0x41   : > { %489 = vmatmul.mubr.bf16.vlgmr.msra.gmra.mrb[0].mxu0 %v359_v33 }
 0x114   : > { %v490_v41 = vpop.f32.mrb[0].mxu0 }
 0x115   : > { %v518_v42 = vadd.f32 %v511_v39, %v490_v41  ;;  %v492_v43 = vpop.f32.mrb[1].mxu0 }
 0x116   : > { %v519_v44 = vadd.f32 %v515_v40, %v492_v43  ;;  %v494_v45 = vpop.f32.mrb[2].mxu0 }
 0x117   : > { %520 = vst [vmem:[%s348_s18] sm:$0xff] %v518_v42  ;;  %v495_v46 = vpop.f32.mrb[3].mxu0 }
 0x118   : > { %521 = vst [vmem:[%s348_s18 + $0x8] sm:$0xff] %v519_v44 }
 0x119 PF: > { %s13_s16 = sadd.s32 1, %s777_s16   ;;  %s893_s12 = smov %s765_s13 }
 0x11a   : > { %p10_p10 = scmp.ge.s32.totalorder %s13_s16, 5   ;;  %s894_s13 = smov %s835_s20 }
 0x11b   : > { %s895_s14 = smov %s773_s15  ;;  %s896_s15 = smov %s898_s17 }
 0x11c   :  { %12 = sbr.rel (!%p10_p10) target bundleno = 3 (0x3), region = 119 }

// kernel: aejepa_forward.17
= control target key start
LH: loop header
LB: loop body
LE: loop exit
PB: predicated region body
PF: predicated region fallthrough
CT: control target
= control target key end

     0   :  { %v227_v0 = vmov 0.0   ;;  %vm228_vm0 = vmmov 0   ;;  %s282_s1 = inlined_call_operand.vmem [shape: bf16[128,128], index: 1, kind: input, shape index: {}]   ;;  %s283_s0 = inlined_call_operand.vmem [shape: bf16[16,128], index: 0, kind: input, shape index: {}]   ;;  %s284_s2 = inlined_call_operand.vmem [shape: f32[1,128], index: 2, kind: input, shape index: {}]   ;;  %s285_s3 = inlined_call_operand.vmem [shape: bf16[16,128], index: 3, kind: output, shape index: {}]  }
   0x1   :  { %196 = vmatprep.subr.bf16.mxu0 %v227_v0  ;;  %v218_v1 = vld [vmem:[%s282_s1] sm:$0xff]   ;;  %212 = vmatprep.mubr.msk.bf16.mxu0 %vm228_vm0, %v227_v0  ;;  %v219_v2 = vld [vmem:[%s282_s1 + $0x8] sm:$0xff]   ;;  %v220_v3 = vld [vmem:[%s282_s1 + $0x10] sm:$0xff]  }
   0x2   :  { %197 = vmatpush3.bf16.msra.mxu0 %v218_v1  ;;  %v221_v4 = vld [vmem:[%s282_s1 + $0x18] sm:$0xff]   ;;  %v222_v5 = vld [vmem:[%s282_s1 + $0x20] sm:$0xff]   ;;  %v223_v6 = vld [vmem:[%s282_s1 + $0x28] sm:$0xff]  }
   0x3   :  { %198 = vmatprep.subr.bf16.mxu0 %v227_v0  ;;  %v224_v7 = vld [vmem:[%s282_s1 + $0x30] sm:$0xff]   ;;  %v225_v8 = vld [vmem:[%s282_s1 + $0x38] sm:$0xff]   ;;  %v226_v9 = vld [vmem:[%s283_s0] sm:$0xff]  }
   0x4   :  { %v177_v11 = vld [vmem:[%s284_s2] ss:$0 sm:$0xff] }
   0x6   :  { %199 = vmatpush3.bf16.msra.mxu0 %v219_v2 }
   0x7   :  { %200 = vmatprep.subr.bf16.mxu0 %v227_v0 }
   0xa   :  { %201 = vmatpush3.bf16.msra.mxu0 %v220_v3 }
   0xb   :  { %202 = vmatprep.subr.bf16.mxu0 %v227_v0 }
   0xe   :  { %203 = vmatpush3.bf16.msra.mxu0 %v221_v4 }
   0xf   :  { %204 = vmatprep.subr.bf16.mxu0 %v227_v0 }
  0x12   :  { %205 = vmatpush3.bf16.msra.mxu0 %v222_v5 }
  0x13   :  { %206 = vmatprep.subr.bf16.mxu0 %v227_v0 }
  0x16   :  { %207 = vmatpush3.bf16.msra.mxu0 %v223_v6 }
  0x17   :  { %208 = vmatprep.subr.bf16.mxu0 %v227_v0 }
  0x1a   :  { %209 = vmatpush3.bf16.msra.mxu0 %v224_v7 }
  0x1b   :  { %210 = vmatprep.subr.bf16.mxu0 %v227_v0 }
  0x1e   :  { %211 = vmatpush3.bf16.msra.mxu0 %v225_v8 }
  0x21   :  { %213 = vmatmul.mubr.bf16.vlgmr.msra.gmra.mrb[0].mxu0 %v226_v9 }
  0xf4   :  { %v129_v10 = vpop.f32.mrb[0].mxu0 }
  0xf5   :  { %v214_v12 = vpop.f32.mrb[1].mxu0  ;;  %v152_v14 = vadd.f32 %v177_v11, %v129_v10 }
  0xf6   :  { %v132_v13 = vpop.f32.mrb[2].mxu0 }
  0xf7   :  { %v153_v15 = vadd.f32 %v177_v11, %v132_v13  ;;  %v215_v16 = vpop.f32.mrb[3].mxu0 }
  0xf9   :  { %v185_v17 = vpack.c.bf16 %v153_v15, %v152_v14 }
  0xfb   :  { %186 = vst [vmem:[%s285_s3] sm:$0xff] %v185_v17  }

// kernel: aejepa_forward.16
= control target key start
LH: loop header
LB: loop body
LE: loop exit
PB: predicated region body
PF: predicated region fallthrough
CT: control target
= control target key end

     0   :  { %v1229_v49 = vmov 0   ;;  %s1618_s0 = inlined_call_operand.vmem [shape: bf16[24,128], index: 0, kind: input, shape index: {}]   ;;  %s1619_s3 = inlined_call_operand.vmem [shape: bf16[128,512], index: 3, kind: input, shape index: {}]   ;;  %s1620_s1 = inlined_call_operand.vmem [shape: f32[1,128], index: 1, kind: input, shape index: {}]   ;;  %s1621_s2 = inlined_call_operand.vmem [shape: f32[1,128], index: 2, kind: input, shape index: {}]   ;;  %s1622_s5 = inlined_call_operand.vmem [shape: bf16[512,128], index: 5, kind: input, shape index: {}]   ;;  %s1623_s4 = inlined_call_operand.vmem [shape: f32[1,512], index: 4, kind: input, shape index: {}]   ;;  %s1624_s6 = inlined_call_operand.vmem [shape: f32[1,128], index: 6, kind: input, shape index: {}]   ;;  %s1625_s7 = inlined_call_operand.vmem [shape: bf16[24,128], index: 7, kind: output, shape index: {}]  }
   0x1   :  { %v1043_v0 = vld [vmem:[%s1618_s0] sm:$0xff]   ;;  %v33_v1 = vld [vmem:[%s1618_s0 + $0x8] sm:$0xf]  ;;  %v1119_v18 = vld [vmem:[%s1619_s3 + $0xc] ss:$16 sps:$4 sm:$0xff]   ;;  %369 = vmatprep.mubr.bf16.mxu0 %v1229_v49  ;;  %420 = vmatprep.mubr.bf16.mxu1 %v1229_v49 }
   0x2   :  { %v1276_v2 = vunpack.c.l.bf16 %v1043_v0  ;;  %v36_v3 = vunpack.c.l.bf16 %v33_v1  ;;  %v1279_v4 = vunpack.c.h.bf16 %v1043_v0  ;;  %v1117_v17 = vld [vmem:[%s1619_s3 + $0x4] ss:$16 sps:$4 sm:$0xff]   ;;  %v1121_v19 = vld [vmem:[%s1619_s3] ss:$16 sps:$4 sm:$0xff]   ;;  %v1122_v20 = vld [vmem:[%s1619_s3 + $0x8] ss:$16 sps:$4 sm:$0xff]   ;;  %388 = vmatprep.subr.bf16.mxu1 %v1119_v18 }
   0x3   :  { %337 = vmatprep.subr.bf16.mxu0 %v1117_v17  ;;  %389 = vmatpush1.bf16.msra.mxu1 %v1122_v20  ;;  %v1123_v21 = vld [vmem:[%s1619_s3 + $0x24] ss:$16 sps:$4 sm:$0xff]   ;;  %v1125_v22 = vld [vmem:[%s1619_s3 + $0x2c] ss:$16 sps:$4 sm:$0xff]   ;;  %v1127_v23 = vld [vmem:[%s1619_s3 + $0x20] ss:$16 sps:$4 sm:$0xff]  }
   0x4   :  { %37 = vadd.xlane.f32.xlu0 %v1276_v2  ;;  %41 = vadd.xlane.f32.xlu1 %v36_v3  ;;  %v1128_v24 = vld [vmem:[%s1619_s3 + $0x28] ss:$16 sps:$4 sm:$0xff]   ;;  %v1129_v25 = vld [vmem:[%s1619_s3 + $0x44] ss:$16 sps:$4 sm:$0xff]   ;;  %v1131_v26 = vld [vmem:[%s1619_s3 + $0x4c] ss:$16 sps:$4 sm:$0xff]  }
   0x5   :  { %338 = vmatpush1.bf16.msra.mxu0 %v1121_v19  ;;  %390 = vmatprep.subr.bf16.mxu1 %v1125_v22  ;;  %v1133_v27 = vld [vmem:[%s1619_s3 + $0x40] ss:$16 sps:$4 sm:$0xff]   ;;  %v1134_v28 = vld [vmem:[%s1619_s3 + $0x48] ss:$16 sps:$4 sm:$0xff]   ;;  %v1135_v29 = vld [vmem:[%s1619_s3 + $0x64] ss:$16 sps:$4 sm:$0xff]  }
   0x6   :  { %339 = vmatprep.subr.bf16.mxu0 %v1123_v21  ;;  %v1137_v30 = vld [vmem:[%s1619_s3 + $0x6c] ss:$16 sps:$4 sm:$0xff]   ;;  %v1139_v31 = vld [vmem:[%s1619_s3 + $0x60] ss:$16 sps:$4 sm:$0xff]   ;;  %v1140_v32 = vld [vmem:[%s1619_s3 + $0x68] ss:$16 sps:$4 sm:$0xff]  }
   0x7   :  { %391 = vmatpush1.bf16.msra.mxu1 %v1128_v24  ;;  %v1141_v33 = vld [vmem:[%s1619_s3 + $0x84] ss:$16 sps:$4 sm:$0xff]   ;;  %v1143_v34 = vld [vmem:[%s1619_s3 + $0x8c] ss:$16 sps:$4 sm:$0xff]   ;;  %v1145_v35 = vld [vmem:[%s1619_s3 + $0x80] ss:$16 sps:$4 sm:$0xff]  }
   0x8   :  { %39 = vadd.xlane.f32.xlu0 %v1279_v4  ;;  %392 = vmatprep.subr.bf16.mxu1 %v1131_v26  ;;  %v1146_v36 = vld [vmem:[%s1619_s3 + $0x88] ss:$16 sps:$4 sm:$0xff]   ;;  %v1147_v37 = vld [vmem:[%s1619_s3 + $0xa4] ss:$16 sps:$4 sm:$0xff]   ;;  %v1149_v38 = vld [vmem:[%s1619_s3 + $0xac] ss:$16 sps:$4 sm:$0xff]  }
   0x9   :  { %340 = vmatpush1.bf16.msra.mxu0 %v1127_v23  ;;  %v1151_v39 = vld [vmem:[%s1619_s3 + $0xa0] ss:$16 sps:$4 sm:$0xff]   ;;  %v1152_v40 = vld [vmem:[%s1619_s3 + $0xa8] ss:$16 sps:$4 sm:$0xff]   ;;  %v1153_v41 = vld [vmem:[%s1619_s3 + $0xc4] ss:$16 sps:$4 sm:$0xff]  }
   0xa   :  { %341 = vmatprep.subr.bf16.mxu0 %v1129_v25  ;;  %v1155_v42 = vld [vmem:[%s1619_s3 + $0xcc] ss:$16 sps:$4 sm:$0xff]   ;;  %v1157_v43 = vld [vmem:[%s1619_s3 + $0xc0] ss:$16 sps:$4 sm:$0xff]   ;;  %v1158_v44 = vld [vmem:[%s1619_s3 + $0xc8] ss:$16 sps:$4 sm:$0xff]  }
   0xb   :  { %393 = vmatpush1.bf16.msra.mxu1 %v1134_v28  ;;  %v1159_v45 = vld [vmem:[%s1619_s3 + $0xe4] ss:$16 sps:$4 sm:$0xff]   ;;  %v1161_v46 = vld [vmem:[%s1619_s3 + $0xec] ss:$16 sps:$4 sm:$0xff]   ;;  %v1163_v47 = vld [vmem:[%s1619_s3 + $0xe0] ss:$16 sps:$4 sm:$0xff]  }
   0xc   :  { %394 = vmatprep.subr.bf16.mxu1 %v1137_v30  ;;  %v1164_v48 = vld [vmem:[%s1619_s3 + $0xe8] ss:$16 sps:$4 sm:$0xff]   ;;  %v961_v61 = vld [vmem:[%s1620_s1] ss:$0 sm:$0xff]  ;;  %v1175_v23 = vld [vmem:[%s1622_s5 + $0x50] sm:$0xff]  }
   0xd   :  { %342 = vmatpush1.bf16.msra.mxu0 %v1133_v27  ;;  %v1169_v17 = vld [vmem:[%s1622_s5] sm:$0xff]   ;;  %v1171_v19 = vld [vmem:[%s1622_s5 + $0x48] sm:$0xff]   ;;  %v1176_v24 = vld [vmem:[%s1622_s5 + $0xd0] sm:$0xff]  }
   0xe   :  { %343 = vmatprep.subr.bf16.mxu0 %v1135_v29  ;;  %v1170_v18 = vld [vmem:[%s1622_s5 + $0x80] sm:$0xff]   ;;  %v1172_v20 = vld [vmem:[%s1622_s5 + $0xc8] sm:$0xff]   ;;  %v1177_v25 = vld [vmem:[%s1622_s5 + $0x10] sm:$0xff]  }
   0xf   :  { %395 = vmatpush1.bf16.msra.mxu1 %v1140_v32  ;;  %v1173_v21 = vld [vmem:[%s1622_s5 + $0x8] sm:$0xff]   ;;  %v1178_v26 = vld [vmem:[%s1622_s5 + $0x90] sm:$0xff]   ;;  %v1179_v27 = vld [vmem:[%s1622_s5 + $0x58] sm:$0xff]  }
  0x10   :  { %396 = vmatprep.subr.bf16.mxu1 %v1143_v34  ;;  %v1174_v22 = vld [vmem:[%s1622_s5 + $0x88] sm:$0xff]   ;;  %v1180_v28 = vld [vmem:[%s1622_s5 + $0xd8] sm:$0xff]   ;;  %v1184_v32 = vld [vmem:[%s1622_s5 + $0xe0] sm:$0xff]  }
  0x11   :  { %344 = vmatpush1.bf16.msra.mxu0 %v1139_v31  ;;  %v1181_v29 = vld [vmem:[%s1622_s5 + $0x18] sm:$0xff]   ;;  %v1183_v31 = vld [vmem:[%s1622_s5 + $0x60] sm:$0xff]  }
  0x12   :  { %345 = vmatprep.subr.bf16.mxu0 %v1141_v33  ;;  %v1182_v30 = vld [vmem:[%s1622_s5 + $0x98] sm:$0xff]   ;;  %v1185_v33 = vld [vmem:[%s1622_s5 + $0x20] sm:$0xff]  }
  0x13   :  { %397 = vmatpush1.bf16.msra.mxu1 %v1146_v36  ;;  %v1186_v34 = vld [vmem:[%s1622_s5 + $0xa0] sm:$0xff]   ;;  %v1188_v36 = vld [vmem:[%s1622_s5 + $0xe8] sm:$0xff]  }
  0x14   :  { %398 = vmatprep.subr.bf16.mxu1 %v1149_v38  ;;  %v1190_v38 = vld [vmem:[%s1622_s5 + $0xa8] sm:$0xff]  }
  0x15   :  { %346 = vmatpush1.bf16.msra.mxu0 %v1145_v35  ;;  %v1187_v35 = vld [vmem:[%s1622_s5 + $0x68] sm:$0xff]  }
  0x16   :  { %347 = vmatprep.subr.bf16.mxu0 %v1147_v37  ;;  %v1189_v37 = vld [vmem:[%s1622_s5 + $0x28] sm:$0xff]  }
  0x17   :  { %399 = vmatpush1.bf16.msra.mxu1 %v1152_v40  ;;  %v1192_v40 = vld [vmem:[%s1622_s5 + $0xf0] sm:$0xff]  }
  0x18   :  { %400 = vmatprep.subr.bf16.mxu1 %v1155_v42  ;;  %v1194_v42 = vld [vmem:[%s1622_s5 + $0xb0] sm:$0xff]  }
  0x19   :  { %348 = vmatpush1.bf16.msra.mxu0 %v1151_v39  ;;  %v1191_v39 = vld [vmem:[%s1622_s5 + $0x70] sm:$0xff]  }
  0x1a   :  { %349 = vmatprep.subr.bf16.mxu0 %v1153_v41  ;;  %v1193_v41 = vld [vmem:[%s1622_s5 + $0x30] sm:$0xff]  }
  0x1b   :  { %401 = vmatpush1.bf16.msra.mxu1 %v1158_v44  ;;  %v1196_v44 = vld [vmem:[%s1622_s5 + $0xf8] sm:$0xff]  }
  0x1c   :  { %402 = vmatprep.subr.bf16.mxu1 %v1161_v46  ;;  %v1198_v46 = vld [vmem:[%s1622_s5 + $0xb8] sm:$0xff]  }
  0x1d   :  { %350 = vmatpush1.bf16.msra.mxu0 %v1157_v43  ;;  %v1195_v43 = vld [vmem:[%s1622_s5 + $0x78] sm:$0xff]  }
  0x1e   :  { %351 = vmatprep.subr.bf16.mxu0 %v1159_v45  ;;  %v1197_v45 = vld [vmem:[%s1622_s5 + $0x38] sm:$0xff]  }
  0x1f   :  { %403 = vmatpush1.bf16.msra.mxu1 %v1164_v48 }
  0x21   :  { %352 = vmatpush1.bf16.msra.mxu0 %v1163_v47  ;;  %v147_v47 = vlaneseq }
  0x23   :  { %v148_v48 = vshrl.u32 %v147_v47, 7 }
  0x91   :  { %v38_v5 = vpop.xlane.xlu0 %37  ;;  %v42_v6 = vpop.xlane.xlu1 %41 }
  0x92   :  { %v44_v7 = vmul.f32 0.0078125, %v38_v5  ;;  %v46_v8 = vmul.f32 0.0078125, %v42_v6  ;;  %v962_v5 = vld [vmem:[%s1621_s2] ss:$0 sm:$0xff] }
  0x94   :  { %v1283_v9 = vsub.f32 %v1276_v2, %v44_v7  ;;  %v1285_v10 = vsub.f32 %v36_v3, %v46_v8 }
  0x95   :  { %v40_v11 = vpop.xlane.xlu0 %39 }
  0x96   :  { %v45_v12 = vmul.f32 0.0078125, %v40_v11  ;;  %v50_v13 = vmul.f32 %v1283_v9, %v1283_v9  ;;  %v52_v15 = vmul.f32 %v1285_v10, %v1285_v10 }
  0x98   :  { %v1290_v14 = vsub.f32 %v1279_v4, %v45_v12  ;;  %53 = vadd.xlane.f32.xlu1 %v50_v13 }
  0x9a   :  { %v51_v16 = vmul.f32 %v1290_v14, %v1290_v14 }
  0x9c   :  { %57 = vadd.xlane.f32.xlu1 %v52_v15  ;;  %55 = vadd.xlane.f32.xlu0 %v51_v16  ;;  %v1168_v16 = vld [vmem:[%s1622_s5 + $0xc0] sm:$0xff]  }
  0x9d   :  { %1088 = vmatprep.subr.bf16.mxu1 %v1168_v16 }
 0x125   :  { %v54_v50 = vpop.xlane.xlu1 %53 }
 0x126   :  { %v59_v51 = vmul.f32 0.0078125, %v54_v50  ;;  %v157_v50 = vsub.s32 2, %v148_v48 }
 0x128   :  { %v62_v52 = vadd.f32 1e-06, %v59_v51  ;;  %v145_v51 = vld [vmem:[%s1623_s4] sm:$0xf] }
 0x129   :  { %v58_v53 = vpop.xlane.xlu1 %57  ;;  %v56_v54 = vpop.xlane.xlu0 %55 }
 0x12a   :  { %1199 = vrsqrt.f32 %v62_v52  ;;  %v61_v55 = vmul.f32 0.0078125, %v58_v53  ;;  %v60_v56 = vmul.f32 0.0078125, %v56_v54  ;;  %v153_v52 = vsub.s32 1, %v148_v48 }
 0x12b   :  { %v161_v53 = vsub.s32 3, %v148_v48 }
 0x12c   :  { %v64_v57 = vadd.f32 1e-06, %v61_v55  ;;  %v63_v58 = vadd.f32 1e-06, %v60_v56  ;;  %v1502_v55 = vrot.slane %v145_v51, %v157_v50  ;;  %v1504_v56 = vrot.slane %v145_v51, %v153_v52 }
 0x12e   :  { %1201 = vrsqrt.f32 %v64_v57  ;;  %v1506_v57 = vrot.slane %v145_v51, %v161_v53 }
 0x12f   :  { %1203 = vrsqrt.f32 %v63_v58 }
 0x134   :  { %v1200_v59 = vpop.eup %1199 }
 0x135   :  { %v68_v60 = vmul.f32 %v1200_v59, %v1283_v9 }
 0x137   :  { %v78_v1 = vmul.f32 %v961_v61, %v68_v60 }
 0x138   :  { %v1202_v62 = vpop.eup %1201 }
 0x139   :  { %v1204_v63 = vpop.eup %1203  ;;  %v70_v0 = vmul.f32 %v1202_v62, %v1285_v10  ;;  %v88_v11 = vadd.f32 %v962_v5, %v78_v1 }
 0x13a   :  { %v69_v3 = vmul.f32 %v1204_v63, %v1290_v14  ;;  %v1167_v14 = vld [vmem:[%s1622_s5 + $0x40] sm:$0xff]  }
 0x13b   :  { %v80_v6 = vmul.f32 %v961_v61, %v70_v0  ;;  %1060 = vmatprep.subr.bf16.mxu0 %v1167_v14 }
 0x13c   :  { %v79_v7 = vmul.f32 %v961_v61, %v69_v3 }
 0x13d   :  { %v90_v8 = vadd.f32 %v962_v5, %v80_v6 }
 0x13e   :  { %v89_v9 = vadd.f32 %v962_v5, %v79_v7 }
 0x13f   :  { %v1038_v12 = vpack.c.bf16 %v90_v8, %v90_v8 }
 0x140   :  { %v1049_v13 = vpack.c.bf16 %v89_v9, %v88_v11 }
 0x141   :  { %106 = vst [vmem:[#allocation2 + $0x8] sm:$0xf] %v1038_v12 }
 0x142   :  { %1050 = vst [vmem:[#allocation2] sm:$0xff] %v1049_v13  }
 0x148   :  { %v1166_v10 = vld [vmem:[#allocation2 + $0x8] ss:$0 sps:$4 sm:$0xff]  }
 0x149   :  { %v1165_v15 = vld [vmem:[#allocation2] sm:$0xff]  }
 0x14a   :  { %370 = vmatmul.mubr.bf16.vlgmr.msra.gmra.mrb[0].mxu0 %v1165_v15  ;;  %421 = vmatmul.mubr.bf16.vlgmr.msra.gmra.mrb[0].mxu1 %v1165_v15 }
 0x14b   :  { %379 = vmatprep.mubr.bf16.mxu0 %v1229_v49  ;;  %430 = vmatprep.mubr.bf16.mxu1 %v1229_v49  ;;  %v149_v49 = vsub.s32 0, %v148_v48 }
 0x14c   :  { %1061 = vmatpush3.bf16.msra.mxu0 %v1169_v17  ;;  %1089 = vmatpush3.bf16.msra.mxu1 %v1170_v18 }
 0x14d   :  { %1062 = vmatprep.subr.bf16.mxu0 %v1171_v19  ;;  %1090 = vmatprep.subr.bf16.mxu1 %v1172_v20  ;;  %v1500_v54 = vrot.slane %v145_v51, %v149_v49 }
 0x150   :  { %1063 = vmatpush3.bf16.msra.mxu0 %v1173_v21  ;;  %1091 = vmatpush3.bf16.msra.mxu1 %v1174_v22 }
 0x151   :  { %1064 = vmatprep.subr.bf16.mxu0 %v1175_v23  ;;  %1092 = vmatprep.subr.bf16.mxu1 %v1176_v24 }
 0x152   :  { %380 = vmatmul.mubr.bf16.gmra.mrb[4].mxu0 %v1166_v10  ;;  %431 = vmatmul.mubr.bf16.gmra.mrb[4].mxu1 %v1166_v10 }
 0x154   :  { %1065 = vmatpush3.bf16.msra.mxu0 %v1177_v25  ;;  %1093 = vmatpush3.bf16.msra.mxu1 %v1178_v26 }
 0x155   :  { %1066 = vmatprep.subr.bf16.mxu0 %v1179_v27  ;;  %1094 = vmatprep.subr.bf16.mxu1 %v1180_v28 }
 0x158   :  { %1067 = vmatpush3.bf16.msra.mxu0 %v1181_v29  ;;  %1095 = vmatpush3.bf16.msra.mxu1 %v1182_v30 }
 0x159   :  { %1068 = vmatprep.subr.bf16.mxu0 %v1183_v31  ;;  %1096 = vmatprep.subr.bf16.mxu1 %v1184_v32 }
 0x15c   :  { %1069 = vmatpush3.bf16.msra.mxu0 %v1185_v33  ;;  %1097 = vmatpush3.bf16.msra.mxu1 %v1186_v34 }
 0x15d   :  { %1070 = vmatprep.subr.bf16.mxu0 %v1187_v35  ;;  %1098 = vmatprep.subr.bf16.mxu1 %v1188_v36 }
 0x160   :  { %1071 = vmatpush3.bf16.msra.mxu0 %v1189_v37  ;;  %1099 = vmatpush3.bf16.msra.mxu1 %v1190_v38 }
 0x161   :  { %1072 = vmatprep.subr.bf16.mxu0 %v1191_v39  ;;  %1100 = vmatprep.subr.bf16.mxu1 %v1192_v40 }
 0x164   :  { %1073 = vmatpush3.bf16.msra.mxu0 %v1193_v41  ;;  %1101 = vmatpush3.bf16.msra.mxu1 %v1194_v42 }
 0x165   :  { %1074 = vmatprep.subr.bf16.mxu0 %v1195_v43  ;;  %1102 = vmatprep.subr.bf16.mxu1 %v1196_v44 }
 0x168   :  { %1075 = vmatpush3.bf16.msra.mxu0 %v1197_v45  ;;  %1103 = vmatpush3.bf16.msra.mxu1 %v1198_v46 }
 0x21d   :  { %v371_v58 = vpop.f32.mrb[0].mxu0  ;;  %v422_v59 = vpop.f32.mrb[0].mxu1 }
 0x21e   :  { %v1509_v60 = vadd.f32 %v371_v58, %v1500_v54  ;;  %v1512_v61 = vadd.f32 %v422_v59, %v1502_v55  ;;  %v373_v62 = vpop.f32.mrb[1].mxu0  ;;  %v424_v63 = vpop.f32.mrb[1].mxu1 }
 0x21f   :  { %v1515_v0 = vadd.f32 %v373_v62, %v1504_v56  ;;  %v1518_v1 = vadd.f32 %v424_v63, %v1506_v57  ;;  %v375_v3 = vpop.f32.mrb[2].mxu0  ;;  %v426_v5 = vpop.f32.mrb[2].mxu1 }
 0x220   :  { %v439_v6 = vmul.f32 %v1509_v60, %v1509_v60  ;;  %v441_v7 = vmul.f32 %v1512_v61, %v1512_v61  ;;  %v1525_v8 = vadd.f32 %v375_v3, %v1500_v54  ;;  %v1528_v11 = vadd.f32 %v426_v5, %v1502_v55  ;;  %v377_v9 = vpop.f32.mrb[3].mxu0  ;;  %v428_v12 = vpop.f32.mrb[3].mxu1 }
 0x221   :  { %v440_v13 = vmul.f32 %v1515_v0, %v1515_v0  ;;  %v442_v15 = vmul.f32 %v1518_v1, %v1518_v1  ;;  %v1535_v10 = vadd.f32 %v377_v9, %v1504_v56  ;;  %v1538_v14 = vadd.f32 %v428_v12, %v1506_v57 }
 0x222   :  { %v451_v16 = vmul.f32 %v439_v6, %v1509_v60  ;;  %v453_v17 = vmul.f32 %v441_v7, %v1512_v61  ;;  %v443_v18 = vmul.f32 %v1525_v8, %v1525_v8  ;;  %v445_v19 = vmul.f32 %v1528_v11, %v1528_v11 }
 0x223   :  { %v452_v20 = vmul.f32 %v440_v13, %v1515_v0  ;;  %v454_v21 = vmul.f32 %v442_v15, %v1518_v1  ;;  %v444_v22 = vmul.f32 %v1535_v10, %v1535_v10  ;;  %v446_v23 = vmul.f32 %v1538_v14, %v1538_v14 }
 0x224   :  { %v463_v24 = vmul.f32 0.044715, %v451_v16  ;;  %v465_v25 = vmul.f32 0.044715, %v453_v17  ;;  %v455_v26 = vmul.f32 %v443_v18, %v1525_v8  ;;  %v457_v27 = vmul.f32 %v445_v19, %v1528_v11 }
 0x225   :  { %v464_v28 = vmul.f32 0.044715, %v452_v20  ;;  %v466_v29 = vmul.f32 0.044715, %v454_v21  ;;  %v456_v30 = vmul.f32 %v444_v22, %v1535_v10  ;;  %v458_v31 = vmul.f32 %v446_v23, %v1538_v14  ;;  %v381_v32 = vpop.f32.mrb[4].mxu0  ;;  %v432_v33 = vpop.f32.mrb[4].mxu1 }
 0x226   :  { %v475_v34 = vadd.f32 %v463_v24, %v1509_v60  ;;  %v477_v35 = vadd.f32 %v465_v25, %v1512_v61  ;;  %v467_v36 = vmul.f32 0.044715, %v455_v26  ;;  %v469_v37 = vmul.f32 0.044715, %v457_v27  ;;  %v383_v38 = vpop.f32.mrb[5].mxu0  ;;  %v434_v39 = vpop.f32.mrb[5].mxu1 }
 0x227   :  { %v476_v40 = vadd.f32 %v464_v28, %v1515_v0  ;;  %v478_v41 = vadd.f32 %v466_v29, %v1518_v1  ;;  %v468_v42 = vmul.f32 0.044715, %v456_v30  ;;  %v470_v43 = vmul.f32 0.044715, %v458_v31  ;;  %v385_v44 = vpop.f32.mrb[6].mxu0  ;;  %v436_v45 = vpop.f32.mrb[6].mxu1 }
 0x228   :  { %v487_v46 = vmul.f32 0.7978846, %v475_v34  ;;  %v489_v47 = vmul.f32 0.7978846, %v477_v35  ;;  %v479_v48 = vadd.f32 %v467_v36, %v1525_v8  ;;  %v481_v49 = vadd.f32 %v469_v37, %v1528_v11  ;;  %v386_v50 = vpop.f32.mrb[7].mxu0  ;;  %v437_v51 = vpop.f32.mrb[7].mxu1 }
 0x229   :  { %v488_v52 = vmul.f32 0.7978846, %v476_v40  ;;  %v490_v53 = vmul.f32 0.7978846, %v478_v41  ;;  %v480_v58 = vadd.f32 %v468_v42, %v1535_v10  ;;  %v482_v59 = vadd.f32 %v470_v43, %v1538_v14 }
 0x22a   :  { %1205 = vtanh.f32 %v487_v46  ;;  %v491_v62 = vmul.f32 0.7978846, %v479_v48  ;;  %v1565_v63 = vadd.f32 %v381_v32, %v1500_v54  ;;  %v493_v3 = vmul.f32 0.7978846, %v481_v49 }
 0x22b   :  { %1207 = vtanh.f32 %v489_v47  ;;  %v492_v5 = vmul.f32 0.7978846, %v480_v58  ;;  %v1568_v6 = vadd.f32 %v432_v33, %v1502_v55  ;;  %v1573_v9 = vadd.f32 %v383_v38, %v1504_v56 }
 0x22c   :  { %1209 = vtanh.f32 %v488_v52  ;;  %v447_v7 = vmul.f32 %v1565_v63, %v1565_v63  ;;  %v1576_v12 = vadd.f32 %v434_v39, %v1506_v57  ;;  %v494_v13 = vmul.f32 0.7978846, %v482_v59 }
 0x22d   :  { %1211 = vtanh.f32 %v490_v53  ;;  %v449_v54 = vmul.f32 %v1568_v6, %v1568_v6  ;;  %v448_v55 = vmul.f32 %v1573_v9, %v1573_v9 }
 0x22e   :  { %1213 = vtanh.f32 %v491_v62  ;;  %v459_v15 = vmul.f32 %v447_v7, %v1565_v63  ;;  %v450_v16 = vmul.f32 %v1576_v12, %v1576_v12 }
 0x22f   :  { %1215 = vtanh.f32 %v493_v3  ;;  %v461_v56 = vmul.f32 %v449_v54, %v1568_v6  ;;  %v460_v17 = vmul.f32 %v448_v55, %v1573_v9 }
 0x230   :  { %1217 = vtanh.f32 %v492_v5  ;;  %v471_v57 = vmul.f32 0.044715, %v459_v15  ;;  %v462_v18 = vmul.f32 %v450_v16, %v1576_v12 }
 0x231   :  { %1219 = vtanh.f32 %v494_v13  ;;  %v473_v19 = vmul.f32 0.044715, %v461_v56  ;;  %v472_v21 = vmul.f32 0.044715, %v460_v17 }
 0x232   :  { %v483_v20 = vadd.f32 %v471_v57, %v1565_v63  ;;  %v474_v22 = vmul.f32 0.044715, %v462_v18 }
 0x233   :  { %v485_v23 = vadd.f32 %v473_v19, %v1568_v6  ;;  %v484_v26 = vadd.f32 %v472_v21, %v1573_v9 }
 0x234   :  { %v1206_v24 = vpop.eup %1205  ;;  %v495_v25 = vmul.f32 0.7978846, %v483_v20  ;;  %v486_v27 = vadd.f32 %v474_v22, %v1576_v12 }
 0x235   :  { %v1208_v28 = vpop.eup %1207  ;;  %v511_v29 = vadd.f32 1.0, %v1206_v24  ;;  %v497_v30 = vmul.f32 0.7978846, %v485_v23  ;;  %v496_v33 = vmul.f32 0.7978846, %v484_v26 }
 0x236   :  { %v1210_v31 = vpop.eup %1209  ;;  %v513_v32 = vadd.f32 1.0, %v1208_v28  ;;  %1221 = vtanh.f32 %v495_v25  ;;  %v498_v34 = vmul.f32 0.7978846, %v486_v27 }
 0x237   :  { %v1212_v35 = vpop.eup %1211  ;;  %1223 = vtanh.f32 %v497_v30  ;;  %v512_v36 = vadd.f32 1.0, %v1210_v31  ;;  %v523_v40 = vmul.f32 0.5, %v511_v29 }
 0x238   :  { %v1214_v37 = vpop.eup %1213  ;;  %1225 = vtanh.f32 %v496_v33  ;;  %v514_v38 = vadd.f32 1.0, %v1212_v35  ;;  %v525_v43 = vmul.f32 0.5, %v513_v32 }
 0x239   :  { %v1216_v39 = vpop.eup %1215  ;;  %v515_v41 = vadd.f32 1.0, %v1214_v37  ;;  %1227 = vtanh.f32 %v498_v34  ;;  %v524_v48 = vmul.f32 0.5, %v512_v36  ;;  %v535_v52 = vmul.f32 %v523_v40, %v1509_v60 }
 0x23a   :  { %v1218_v42 = vpop.eup %1217  ;;  %v517_v44 = vadd.f32 1.0, %v1216_v39  ;;  %v526_v51 = vmul.f32 0.5, %v514_v38  ;;  %v537_v59 = vmul.f32 %v525_v43, %v1512_v61 }
 0x23b   :  { %v1220_v45 = vpop.eup %1219  ;;  %v527_v46 = vmul.f32 0.5, %v515_v41  ;;  %v516_v47 = vadd.f32 1.0, %v1218_v42  ;;  %v536_v7 = vmul.f32 %v524_v48, %v1515_v0 }
 0x23c   :  { %v529_v49 = vmul.f32 0.5, %v517_v44  ;;  %v518_v50 = vadd.f32 1.0, %v1220_v45  ;;  %v538_v55 = vmul.f32 %v526_v51, %v1518_v1 }
 0x23d   :  { %v539_v53 = vmul.f32 %v527_v46, %v1525_v8  ;;  %v528_v58 = vmul.f32 0.5, %v516_v47  ;;  %v934_v46 = vld [vmem:[%s1618_s0 + $0x8] sm:$0xf] }
 0x23e   :  { %v541_v62 = vmul.f32 %v529_v49, %v1528_v11  ;;  %v530_v3 = vmul.f32 0.5, %v518_v50 }
 0x23f   :  { %v550_v5 = vpack.c.bf16 %v539_v53, %v535_v52  ;;  %v540_v13 = vmul.f32 %v528_v58, %v1535_v10 }
 0x240   :  { %v1222_v54 = vpop.eup %1221  ;;  %v552_v15 = vpack.c.bf16 %v541_v62, %v537_v59  ;;  %v542_v16 = vmul.f32 %v530_v3, %v1538_v14  ;;  %v937_v62 = vunpack.c.l.bf16 %v934_v46 }
 0x241   :  { %v1224_v60 = vpop.eup %1223  ;;  %v551_v56 = vpack.c.bf16 %v540_v13, %v536_v7  ;;  %v519_v8 = vadd.f32 1.0, %v1222_v54 }
 0x242   :  { %v1226_v57 = vpop.eup %1225  ;;  %v553_v17 = vpack.c.bf16 %v542_v16, %v538_v55  ;;  %v521_v61 = vadd.f32 1.0, %v1224_v60 }
 0x243   :  { %v1228_v18 = vpop.eup %1227  ;;  %846 = vmatprep.mubr.bf16.mxu0 %v551_v56  ;;  %v520_v11 = vadd.f32 1.0, %v1226_v57  ;;  %v531_v19 = vmul.f32 0.5, %v519_v8 }
 0x244   :  { %894 = vmatprep.mubr.bf16.mxu1 %v553_v17  ;;  %847 = vmatmul.mubr.bf16.vlgmr.msra.gmra.mrb[8].mxu0 %v550_v5  ;;  %v522_v0 = vadd.f32 1.0, %v1228_v18  ;;  %v533_v10 = vmul.f32 0.5, %v521_v61 }
 0x245   :  { %895 = vmatmul.mubr.bf16.vlgmr.msra.gmra.mrb[8].mxu1 %v552_v15  ;;  %v532_v20 = vmul.f32 0.5, %v520_v11  ;;  %v543_v1 = vmul.f32 %v531_v19, %v1565_v63 }
 0x246   :  { %v534_v21 = vmul.f32 0.5, %v522_v0  ;;  %v545_v22 = vmul.f32 %v533_v10, %v1568_v6  ;;  %v1032_v6 = vld [vmem:[%s1624_s6] ss:$0 sm:$0xff] }
 0x247   :  { %v544_v14 = vmul.f32 %v532_v20, %v1573_v9  ;;  %v554_v26 = vpack.c.bf16 %v543_v1, %v543_v1 }
 0x248   :  { %v546_v23 = vmul.f32 %v534_v21, %v1576_v12  ;;  %v556_v27 = vpack.c.bf16 %v545_v22, %v545_v22 }
 0x249   :  { %v555_v24 = vpack.c.bf16 %v544_v14, %v544_v14 }
 0x24a   :  { %v557_v25 = vpack.c.bf16 %v546_v23, %v546_v23 }
 0x24b   :  { %854 = vmatprep.mubr.bf16.mxu0 %v555_v24 }
 0x24c   :  { %902 = vmatprep.mubr.bf16.mxu1 %v557_v25  ;;  %855 = vmatmul.mubr.bf16.gmra.mrb[12].mxu0 %v554_v26 }
 0x24d   :  { %903 = vmatmul.mubr.bf16.gmra.mrb[12].mxu1 %v556_v27 }
 0x317   :  { %v1076_v28 = vpop.f32.mrb[8].mxu0 }
 0x318   :  { %v1104_v29 = vpop.f32.mrb[8].mxu1  ;;  %v1077_v30 = vpop.f32.mrb[9].mxu0 }
 0x319   :  { %v1078_v31 = vadd.f32 %v1077_v30, %v1076_v28  ;;  %v1105_v32 = vpop.f32.mrb[9].mxu1  ;;  %v1079_v63 = vpop.f32.mrb[10].mxu0 }
 0x31a   :  { %v1106_v33 = vadd.f32 %v1105_v32, %v1104_v29  ;;  %v1107_v9 = vpop.f32.mrb[10].mxu1  ;;  %v1080_v34 = vpop.f32.mrb[11].mxu0 }
 0x31b   :  { %v1081_v12 = vadd.f32 %v1080_v34, %v1079_v63  ;;  %v1108_v35 = vpop.f32.mrb[11].mxu1 }
 0x31c   :  { %v897_v36 = vadd.f32 %v1106_v33, %v1078_v31  ;;  %v1109_v37 = vadd.f32 %v1108_v35, %v1107_v9 }
 0x31e   :  { %v929_v38 = vadd.f32 %v1032_v6, %v897_v36  ;;  %v900_v39 = vadd.f32 %v1109_v37, %v1081_v12 }
 0x31f   :  { %v1082_v40 = vpop.f32.mrb[12].mxu0 }
 0x320   :  { %v930_v41 = vadd.f32 %v1032_v6, %v900_v39  ;;  %v1110_v42 = vpop.f32.mrb[12].mxu1  ;;  %v1083_v43 = vpop.f32.mrb[13].mxu0  ;;  %v938_v48 = vadd.f32 %v1276_v2, %v929_v38 }
 0x321   :  { %v1084_v44 = vadd.f32 %v1083_v43, %v1082_v40  ;;  %v1111_v45 = vpop.f32.mrb[13].mxu1  ;;  %v1085_v47 = vpop.f32.mrb[14].mxu0 }
 0x322   :  { %v939_v49 = vadd.f32 %v1279_v4, %v930_v41  ;;  %v1112_v50 = vadd.f32 %v1111_v45, %v1110_v42  ;;  %v1113_v51 = vpop.f32.mrb[14].mxu1  ;;  %v1086_v52 = vpop.f32.mrb[15].mxu0 }
 0x323   :  { %v1114_v53 = vpop.f32.mrb[15].mxu1 }
 0x324   :  { %v1058_v58 = vpack.c.bf16 %v939_v49, %v938_v48  ;;  %v905_v59 = vadd.f32 %v1112_v50, %v1084_v44 }
 0x326   :  { %v931_v3 = vadd.f32 %v1032_v6, %v905_v59  ;;  %1059 = vst [vmem:[%s1625_s7] sm:$0xff] %v1058_v58  }
 0x328   :  { %v940_v5 = vadd.f32 %v937_v62, %v931_v3 }
 0x32a   :  { %v1041_v7 = vpack.c.bf16 %v940_v5, %v940_v5 }
 0x32c   :  { %956 = vst [vmem:[%s1625_s7 + $0x8] sm:$0xf] %v1041_v7 }

</bundles_post_ra>
